<compile_context>
chip_gen: v6e
topology: v6e:2x2x1
jax: 0.10.0
libtpu: 0.0.40
codegen_flags: <defaults>
</compile_context>

<pallas_src>
import numpy as np
import jax
import jax.numpy as jnp
from jax.experimental import pallas as pl
from jax.experimental.pallas import tpu as pltpu

# ----------------- small synthetic hyper-parameters -----------------
BATCH = 2
SEQ_LEN = 8
WORD_DIMS = 16            # word_dims == pret_dims
TAG_DIMS = 8
LSTM_HIDDENS = 32         # H ; BiLSTM output dim = 2H = 64
LSTM_LAYERS = 3
MLP_HIDDEN = 64           # module hard-codes 150; shrunk for a small synthetic run
REL_SIZE = 43             # must be > 42 so rel_logits[:, :, 42] = 0 is valid
WORDS_IN_TRAIN = 50
VOCAB_SIZE = 60
TAG_SIZE = 12
PAD = 0
NULL_REL = 42
INPUT_DIMS = WORD_DIMS + WORD_DIMS   # word_dims + pret_dims (tag embs not fed to LSTM, per module)

D1_PAD = 128              # 2H+1 = 65 zero-padded to a full lane tile
REL_PAD = 64              # REL_SIZE = 43 zero-padded for aligned MXU feeds / stores


# ===================== Pallas kernels =====================

def make_bilstm_layer_kernel(T, B, H):
    """One BiLSTM layer in a single kernel invocation.

    x_ref:   (T*B, Din)   time-major flattened activations
    wih_ref: (Din, 8H)    [Wih_fwd | Wih_bwd]   (input projection, both directions)
    whhf/whhb: (H, 4H)    recurrent weights per direction
    b_ref:   (1, 8H)      [b_fwd | b_bwd]  (b_ih + b_hh)
    out_ref: (T*B, 2H)    [:, :H] forward hidden at t, [:, H:] backward hidden at t
    """
    def kernel(x_ref, wih_ref, whhf_ref, whhb_ref, b_ref, out_ref,
               xp_ref, hf_ref, cf_ref, hb_ref, cb_ref):
        # Hoisted input projection for all T steps and BOTH directions: one matmul.
        xp_ref[...] = (jnp.dot(x_ref[...], wih_ref[...],
                               preferred_element_type=jnp.float32) + b_ref[...])
        hf_ref[...] = jnp.zeros_like(hf_ref)
        cf_ref[...] = jnp.zeros_like(cf_ref)
        hb_ref[...] = jnp.zeros_like(hb_ref)
        cb_ref[...] = jnp.zeros_like(cb_ref)

        def gates_to_hc(g, c_prev):
            # i, f, g, o gate order (PyTorch layout).  4H = 128 -> one lane-full
            # vreg per row; the 32-lane slices are cheap at these sizes.
            i = jax.nn.sigmoid(g[:, 0 * H:1 * H])
            f = jax.nn.sigmoid(g[:, 1 * H:2 * H])
            gg = jnp.tanh(g[:, 2 * H:3 * H])
            o = jax.nn.sigmoid(g[:, 3 * H:4 * H])
            c = f * c_prev + i * gg
            h = o * jnp.tanh(c)
            return h, c

        # Static (fully unrolled) time loop: T is tiny, all slice indices static.
        for s in range(T):
            tf, tb = s, T - 1 - s
            xp_f = xp_ref[tf * B:(tf + 1) * B, 0:4 * H]          # (B, 4H)
            xp_b = xp_ref[tb * B:(tb + 1) * B, 4 * H:8 * H]      # (B, 4H)
            gf = xp_f + jnp.dot(hf_ref[...], whhf_ref[...],
                                preferred_element_type=jnp.float32)
            gb = xp_b + jnp.dot(hb_ref[...], whhb_ref[...],
                                preferred_element_type=jnp.float32)
            hf, cf = gates_to_hc(gf, cf_ref[...])
            hb, cb = gates_to_hc(gb, cb_ref[...])
            hf_ref[...] = hf
            cf_ref[...] = cf
            hb_ref[...] = hb
            cb_ref[...] = cb
            out_ref[tf * B:(tf + 1) * B, 0:H] = hf
            out_ref[tb * B:(tb + 1) * B, H:2 * H] = hb
    return kernel


def mlp3_kernel(x_ref, w1_ref, b1_ref, w2_ref, b2_ref, w3_ref, b3_ref, o_ref):
    """Fused Linear-ReLU-Linear-ReLU-Linear (dropout = identity, eval semantics)."""
    x = x_ref[...]
    h1 = jnp.maximum(
        jnp.dot(x, w1_ref[...], preferred_element_type=jnp.float32) + b1_ref[...], 0.0)
    h2 = jnp.maximum(
        jnp.dot(h1, w2_ref[...], preferred_element_type=jnp.float32) + b2_ref[...], 0.0)
    o_ref[...] = jnp.dot(h2, w3_ref[...], preferred_element_type=jnp.float32) + b3_ref[...]


def matmul_kernel(a_ref, b_ref, o_ref):
    o_ref[...] = jnp.dot(a_ref[...], b_ref[...], preferred_element_type=jnp.float32)


def bmm_all_kernel(x_ref, v_ref, o_ref):
    """All predicates in one step: (P, L, D) x (P, D, R) -> (P, L, R)."""
    o_ref[...] = jnp.einsum('pld,pdr->plr', x_ref[...], v_ref[...],
                            preferred_element_type=jnp.float32)


# ===================== kernel wrappers =====================

def bilstm_layer(x_flat, wih_cat, whh_f, whh_b, bias_cat, T, B, H):
    """x_flat: (T*B, Din) -> (T*B, 2H); single pallas_call, whole layer VMEM-resident."""
    TB, Din = x_flat.shape
    return pl.pallas_call(
        make_bilstm_layer_kernel(T, B, H),
        out_shape=jax.ShapeDtypeStruct((TB, 2 * H), jnp.float32),
        scratch_shapes=[
            pltpu.VMEM((TB, 8 * H), jnp.float32),   # hoisted input projections
            pltpu.VMEM((B, H), jnp.float32),        # h_fwd
            pltpu.VMEM((B, H), jnp.float32),        # c_fwd
            pltpu.VMEM((B, H), jnp.float32),        # h_bwd
            pltpu.VMEM((B, H), jnp.float32),        # c_bwd
        ],
    )(x_flat, wih_cat, whh_f, whh_b, bias_cat)


def bilstm(emb_btd, lstm_params):
    """emb_btd: (B, L, Din) -> (B, L, 2H)  (full-length sequences).

    Two tiny host transposes total (in / out of the time-major flat layout); no
    per-layer reversal copies or concats — both directions are written by the kernel.
    """
    B, L, Din = emb_btd.shape
    H = LSTM_HIDDENS
    x = jnp.transpose(emb_btd, (1, 0, 2)).reshape(L * B, Din)    # time-major flat
    for lp in lstm_params:
        x = bilstm_layer(x, lp["wih_cat"], lp["whh_f"], lp["whh_b"],
                         lp["bias_cat"], L, B, H)
    return jnp.transpose(x.reshape(L, B, 2 * H), (1, 0, 2))      # (B, L, 2H)


def mlp3(x, w1, b1, w2, b2, w3, b3):
    """x: (N, D) -> (N, out) through the fused 3-layer MLP, single grid step."""
    N = x.shape[0]
    return pl.pallas_call(
        mlp3_kernel,
        out_shape=jax.ShapeDtypeStruct((N, w3.shape[1]), jnp.float32),
    )(x, w1, b1, w2, b2, w3, b3)


def matmul_full(a, b):
    M, K = a.shape
    _, N = b.shape
    return pl.pallas_call(
        matmul_kernel,
        out_shape=jax.ShapeDtypeStruct((M, N), jnp.float32),
    )(a, b)


def bmm_all(x, v):
    P, L, D = x.shape
    R = v.shape[2]
    return pl.pallas_call(
        bmm_all_kernel,
        out_shape=jax.ShapeDtypeStruct((P, L, R), jnp.float32),
    )(x, v)


def bilinear_pallas(x, W_rel, y, rel_size):
    """Biaffine scoring with bias_x=bias_y=True, padded to hardware tiles.
    x: (P, L, D), y: (P, D), W_rel: (D+1, rel_size*(D+1)) -> (P, L, rel_size)."""
    P, L, D = x.shape
    D1 = D + 1
    # bias-augment, then zero-pad features to 128 lanes (numerically identical).
    x_b = jnp.concatenate([x, jnp.ones((P, L, 1), jnp.float32),
                           jnp.zeros((P, L, D1_PAD - D1), jnp.float32)], axis=2)
    y_b = jnp.concatenate([y, jnp.ones((P, 1), jnp.float32),
                           jnp.zeros((P, D1_PAD - D1), jnp.float32)], axis=1)
    # W3[i, r, j]; zero-pad i/j -> 128, r -> 64; reorder to j-major rows (host glue).
    W3 = W_rel.reshape(D1, rel_size, D1)
    W3p = jnp.zeros((D1_PAD, REL_PAD, D1_PAD), jnp.float32).at[:D1, :rel_size, :D1].set(W3)
    Wm = jnp.transpose(W3p, (2, 0, 1)).reshape(D1_PAD, D1_PAD * REL_PAD)
    # kernel 1: V[p, i, r] = sum_j y[p, j] W3[i, r, j]    (host reshape in between)
    V = matmul_full(y_b, Wm).reshape(P, D1_PAD, REL_PAD)
    # kernel 2: scores[p, l, r] = sum_i x[p, l, i] V[p, i, r]
    return bmm_all(x_b, V)[:, :, :rel_size]


# ===================== parameter initialization =====================

def init_mlp3(key, in_dim, hidden):
    k1, k2, k3, k4, k5, k6 = jax.random.split(key, 6)
    return dict(
        w1=jax.random.normal(k1, (in_dim, hidden), jnp.float32) * 0.1,
        b1=jax.random.normal(k2, (1, hidden), jnp.float32) * 0.05,
        w2=jax.random.normal(k3, (hidden, hidden), jnp.float32) * 0.1,
        b2=jax.random.normal(k4, (1, hidden), jnp.float32) * 0.05,
        w3=jax.random.normal(k5, (hidden, 1), jnp.float32) * 0.1,
        b3=jax.random.normal(k6, (1, 1), jnp.float32) * 0.05,
    )


def fuse_dual_head(pa, pp):
    """Fuse the arg and pred uniScore MLPs (same input) into one block-diagonal MLP
    producing a lane-packed (N, 2) output: column 0 = arg score, column 1 = pred."""
    M = pa["w1"].shape[1]
    zero = jnp.zeros((M, M), jnp.float32)
    zcol = jnp.zeros((M, 1), jnp.float32)
    w1 = jnp.concatenate([pa["w1"], pp["w1"]], axis=1)                        # (D, 2M)
    b1 = jnp.concatenate([pa["b1"], pp["b1"]], axis=1)                        # (1, 2M)
    w2 = jnp.concatenate([jnp.concatenate([pa["w2"], zero], axis=1),
                          jnp.concatenate([zero, pp["w2"]], axis=1)], axis=0) # (2M, 2M)
    b2 = jnp.concatenate([pa["b2"], pp["b2"]], axis=1)                        # (1, 2M)
    w3 = jnp.concatenate([jnp.concatenate([pa["w3"], zcol], axis=1),
                          jnp.concatenate([zcol, pp["w3"]], axis=1)], axis=0) # (2M, 2)
    b3 = jnp.concatenate([pa["b3"], pp["b3"]], axis=1)                        # (1, 2)
    return (w1, b1, w2, b2, w3, b3)


def init_params(key):
    H = LSTM_HIDDENS
    keys = jax.random.split(key, 8)
    arg_p = init_mlp3(keys[3], 2 * H, MLP_HIDDEN)
    pred_p = init_mlp3(keys[4], 2 * H, MLP_HIDDEN)
    params = {
        "word_embs": jax.random.normal(keys[0], (WORDS_IN_TRAIN, WORD_DIMS), jnp.float32) * 0.1,
        "pret_embs": jax.random.normal(keys[1], (VOCAB_SIZE, WORD_DIMS), jnp.float32) * 0.1,
        "tag_embs": jax.random.normal(keys[2], (TAG_SIZE, TAG_DIMS), jnp.float32) * 0.1,
        "uni_fused": fuse_dual_head(arg_p, pred_p),
        "mlp_pair_uni": init_mlp3(keys[5], 4 * H, MLP_HIDDEN),
        # module initializes rel_W to zeros; small random used here for non-trivial compute
        "rel_W": jax.random.normal(keys[6], (2 * H + 1, REL_SIZE * (2 * H + 1)), jnp.float32) * 0.01,
        "pair_weight": jnp.array([0.5, 0.5], jnp.float32),
    }
    # BiLSTM weights (PyTorch layout (4H, Din)/(4H, H); transposed + direction-fused)
    lstm = []
    k = keys[7]
    for layer in range(LSTM_LAYERS):
        in_dim = INPUT_DIMS if layer == 0 else 2 * H
        per_dir = {}
        for d in ("fwd", "bwd"):
            k, k1, k2, k3, k4 = jax.random.split(k, 5)
            wih = jax.random.normal(k1, (4 * H, in_dim), jnp.float32) * 0.1
            whh = jax.random.normal(k2, (4 * H, H), jnp.float32) * 0.1
            bih = jax.random.normal(k3, (4 * H,), jnp.float32) * 0.05
            bhh = jax.random.normal(k4, (4 * H,), jnp.float32) * 0.05
            per_dir[d] = (wih.T, whh.T, (bih + bhh).reshape(1, 4 * H))
        wih_f, whh_f, b_f = per_dir["fwd"]
        wih_b, whh_b, b_b = per_dir["bwd"]
        lstm.append(dict(
            wih_cat=jnp.concatenate([wih_f, wih_b], axis=1),   # (in_dim, 8H)
            whh_f=whh_f, whh_b=whh_b,                          # (H, 4H)
            bias_cat=jnp.concatenate([b_f, b_b], axis=1),      # (1, 8H)
        ))
    params["lstm"] = lstm
    return params


# ===================== forward pass =====================

def forward(params, word_inputs, tag_inputs, pred_golds, rel_targets, is_train=True):
    B, L = word_inputs.shape
    H = LSTM_HIDDENS
    R = REL_SIZE

    mask = np.greater(word_inputs, PAD).astype(np.int64)
    num_tokens = np.sum(mask, axis=1)  # noqa: F841  (parity with module)

    wi = jnp.asarray(word_inputs.astype(np.int32))
    ti = jnp.asarray(tag_inputs.astype(np.int32))
    word_embs = jnp.take(params["word_embs"], wi, axis=0)      # (B, L, word_dims)
    pret_embs = jnp.take(params["pret_embs"], wi, axis=0)      # (B, L, pret_dims)
    _tag_embs = jnp.take(params["tag_embs"], ti, axis=0)       # computed for parity; unused downstream
    emb_inputs = jnp.concatenate([word_embs, pret_embs], axis=2)
    # TODO(synk): dropout layers (emb/hidden/mlp) treated as identity (eval semantics).
    # TODO(synk): sort_batch / pack_padded_sequence modeled by choosing full-length
    # sequences (mask all ones), so packing is the identity for these inputs.
    # TODO(synk): weights kept f32 everywhere; bf16 MXU weights (v6e/v7x) not gated in.

    top_recur = bilstm(emb_inputs, params["lstm"])             # (B, L, 2H)
    flat_top = top_recur.reshape(B * L, 2 * H)

    # fused arg+pred uniScore heads: one kernel, lane-packed 2-wide output
    uni_out = mlp3(flat_top, *params["uni_fused"])             # (B*L, 2)
    uniScores_arg = uni_out[:, 0].reshape(B, L)
    uniScores_pred = uni_out[:, 1].reshape(B, L)
    # NOTE: torch.sort of the uniScores feeds a candidate loop that is disabled by
    # `and False` in the original forward, so it has no effect and is skipped here.

    # ---- candidate / target selection (host-side glue, static) ----
    preds_num = [len(p) for p in pred_golds]
    rel_targets_selected, sample_idx, preds_idx, mask_selected = [], [], [], []
    off_t = 0
    for i, cps in enumerate(pred_golds):
        for j, _cand in enumerate(cps):
            rel_targets_selected.append(rel_targets[off_t + j])
        off_t += preds_num[i]
    off_w = 0
    for i in range(B):
        for j in range(len(pred_golds[i])):
            sample_idx.append(i)
            mask_selected.append(mask[i])
            preds_idx.append(pred_golds[i][j] + off_w)
        off_w += int(L)
    P = len(preds_idx)
    sample_idx_j = jnp.asarray(np.array(sample_idx, dtype=np.int32))
    preds_idx_j = jnp.asarray(np.array(preds_idx, dtype=np.int32))

    g_arg_sel = jnp.take(top_recur, sample_idx_j, axis=0)      # (P, L, 2H)
    g_pred_sel = jnp.take(flat_top, preds_idx_j, axis=0)       # (P, 2H)

    bilinear_scores = bilinear_pallas(g_arg_sel, params["rel_W"], g_pred_sel, R)   # (P, L, R)

    g_pred_expand = jnp.broadcast_to(g_pred_sel[:, None, :], (P, L, 2 * H))
    g_pair = jnp.concatenate([g_arg_sel, g_pred_expand], axis=2)                   # (P, L, 4H)
    pp = params["mlp_pair_uni"]
    g_pair_uni = mlp3(g_pair.reshape(P * L, 4 * H),
                      pp["w1"], pp["b1"], pp["w2"], pp["b2"], pp["w3"], pp["b3"]
                      ).reshape(P, L, 1)

    pw = jax.nn.softmax(params["pair_weight"])
    biaffine_scores = pw[0] * bilinear_scores + pw[1] * g_pair_uni                 # (P, L, R)

    uni_pred_sel = jnp.take(uniScores_pred.reshape(B * L, 1), preds_idx_j, axis=0).reshape(P, 1, 1)
    uni_arg_sel = jnp.take(uniScores_arg.reshape(B, L, 1), sample_idx_j, axis=0)   # (P, L, 1)

    rel_logits = biaffine_scores + uni_arg_sel + uni_pred_sel
    rel_logits = rel_logits.at[:, :, NULL_REL].set(0.0)
    flat_rel_logits = rel_logits.reshape(P * L, R)[:, 1:]                          # (P*L, R-1)

    if is_train:
        mask_1D = jnp.asarray(np.array(mask_selected).reshape(-1).astype(np.float32))
        targets_1D = jnp.asarray(np.array(rel_targets_selected).astype(np.int32).reshape(-1)) - 1
        rel_preds = jnp.argmax(flat_rel_logits, axis=1)
        rel_correct = (rel_preds == targets_1D).astype(jnp.float32) * mask_1D
        rel_accuracy = jnp.sum(rel_correct) / jnp.sum(mask_1D)
        # CrossEntropyLoss(ignore_index=-1), mean reduction
        valid = (targets_1D != -1).astype(jnp.float32)
        logp = jax.nn.log_softmax(flat_rel_logits, axis=1)
        nll = -jnp.take_along_axis(logp, jnp.clip(targets_1D, 0)[:, None], axis=1)[:, 0]
        rel_loss = jnp.sum(nll * valid) / jnp.maximum(jnp.sum(valid), 1.0)
        return rel_accuracy, rel_loss

    # eval / counting branch (host-side loop, parity with module)
    rel_probs = jax.nn.softmax(flat_rel_logits, axis=1).reshape(P, L, R - 1)
    rel_predicts = np.asarray(jnp.argmax(rel_probs, axis=2))
    correct_noNull_predict = noNull_predict = noNull_labels = 0
    for msk, label_gold, label_predict in zip(mask_selected, rel_targets, rel_predicts):
        for i in range(len(label_predict)):
            if msk[i] > 0:
                if label_gold[i] - 1 != 41:
                    noNull_labels += 1
                if label_predict[i] != 41:
                    noNull_predict += 1
                    if label_predict[i] == label_gold[i] - 1:
                        correct_noNull_predict += 1
    return correct_noNull_predict, noNull_predict, noNull_labels


# ===================== main =====================

if __name__ == "__main__":
    root = jax.random.PRNGKey(0)
    kparams, kinputs = jax.random.split(root)
    params = init_params(kparams)

    kw, kt = jax.random.split(kinputs)
    # all tokens > PAD so mask is all ones (full-length sequences)
    word_inputs = np.asarray(jax.random.randint(kw, (BATCH, SEQ_LEN), 1, WORDS_IN_TRAIN),
                             dtype=np.int64)
    tag_inputs = np.asarray(jax.random.randint(kt, (BATCH, SEQ_LEN), 0, TAG_SIZE),
                            dtype=np.int64)
    pred_golds = [[1, 3], [2, 5]]                      # gold predicate positions per sentence
    total_preds = sum(len(p) for p in pred_golds)
    rel_targets = (np.arange(total_preds * SEQ_LEN).reshape(total_preds, SEQ_LEN)
                   % (REL_SIZE - 1)).astype(np.int64) + 1   # labels in [1, REL_SIZE-1]

    rel_accuracy, rel_loss = forward(params, word_inputs, tag_inputs,
                                     pred_golds, rel_targets, is_train=True)
    jax.block_until_ready((rel_accuracy, rel_loss))
    assert np.isfinite(float(rel_loss)) and np.isfinite(float(rel_accuracy))
    print("KERNEL_OK")
</pallas_src>

<mosaic_0001>
module attributes {stable_mosaic.version = 11 : i64} {
  func.func @kernel(%arg0: memref<16x32xf32, #tpu.memory_space<vmem>>, %arg1: memref<32x256xf32, #tpu.memory_space<vmem>>, %arg2: memref<32x128xf32, #tpu.memory_space<vmem>>, %arg3: memref<32x128xf32, #tpu.memory_space<vmem>>, %arg4: memref<1x256xf32, #tpu.memory_space<vmem>>, %arg5: memref<16x64xf32, #tpu.memory_space<vmem>>, %arg6: memref<16x256xf32, #tpu.memory_space<vmem>>, %arg7: memref<2x32xf32, #tpu.memory_space<vmem>>, %arg8: memref<2x32xf32, #tpu.memory_space<vmem>>, %arg9: memref<2x32xf32, #tpu.memory_space<vmem>>, %arg10: memref<2x32xf32, #tpu.memory_space<vmem>>) attributes {dimension_semantics = [], scalar_prefetch = 0 : i64, scratch_operands = 5 : i64, tpu.core_type = #tpu.core_type<tc>} {
    %c0 = arith.constant 0 : index
    %c0_0 = arith.constant 0 : index
    %0 = vector.load %arg0[%c0, %c0_0] : memref<16x32xf32, #tpu.memory_space<vmem>>, vector<16x32xf32>
    %c0_1 = arith.constant 0 : index
    %c0_2 = arith.constant 0 : index
    %1 = vector.load %arg1[%c0_1, %c0_2] : memref<32x256xf32, #tpu.memory_space<vmem>>, vector<32x256xf32>
    %cst = arith.constant dense<0.000000e+00> : vector<16x256xf32>
    %2 = tpu.matmul %0, %1, %cst {dimension_numbers = #tpu.dot_dimension_numbers<[1], [0], [0], [1], [0, 0, 1, 1], [], []>} : vector<16x32xf32>, vector<32x256xf32>, vector<16x256xf32> -> vector<16x256xf32>
    %c0_3 = arith.constant 0 : index
    %c0_4 = arith.constant 0 : index
    %3 = vector.load %arg4[%c0_3, %c0_4] : memref<1x256xf32, #tpu.memory_space<vmem>>, vector<1x256xf32>
    %4 = vector.broadcast %3 : vector<1x256xf32> to vector<16x256xf32>
    %5 = arith.addf %2, %4 : vector<16x256xf32>
    %c0_5 = arith.constant 0 : index
    %c0_6 = arith.constant 0 : index
    %6 = vector.load %arg6[%c0_5, %c0_6] : memref<16x256xf32, #tpu.memory_space<vmem>>, vector<16x256xf32>
    tpu.vector_store %arg6[%c0_5, %c0_6], %5 {strides = array<i32>} : memref<16x256xf32, #tpu.memory_space<vmem>>, vector<16x256xf32>,
    %cst_7 = arith.constant 0.000000e+00 : f32
    %7 = vector.broadcast %cst_7 : f32 to vector<2x32xf32>
    %c0_8 = arith.constant 0 : index
    %c0_9 = arith.constant 0 : index
    %8 = vector.load %arg7[%c0_8, %c0_9] : memref<2x32xf32, #tpu.memory_space<vmem>>, vector<2x32xf32>
    tpu.vector_store %arg7[%c0_8, %c0_9], %7 {strides = array<i32>} : memref<2x32xf32, #tpu.memory_space<vmem>>, vector<2x32xf32>,
    %cst_10 = arith.constant 0.000000e+00 : f32
    %9 = vector.broadcast %cst_10 : f32 to vector<2x32xf32>
    %c0_11 = arith.constant 0 : index
    %c0_12 = arith.constant 0 : index
    %10 = vector.load %arg8[%c0_11, %c0_12] : memref<2x32xf32, #tpu.memory_space<vmem>>, vector<2x32xf32>
    tpu.vector_store %arg8[%c0_11, %c0_12], %9 {strides = array<i32>} : memref<2x32xf32, #tpu.memory_space<vmem>>, vector<2x32xf32>,
    %cst_13 = arith.constant 0.000000e+00 : f32
    %11 = vector.broadcast %cst_13 : f32 to vector<2x32xf32>
    %c0_14 = arith.constant 0 : index
    %c0_15 = arith.constant 0 : index
    %12 = vector.load %arg9[%c0_14, %c0_15] : memref<2x32xf32, #tpu.memory_space<vmem>>, vector<2x32xf32>
    tpu.vector_store %arg9[%c0_14, %c0_15], %11 {strides = array<i32>} : memref<2x32xf32, #tpu.memory_space<vmem>>, vector<2x32xf32>,
    %cst_16 = arith.constant 0.000000e+00 : f32
    %13 = vector.broadcast %cst_16 : f32 to vector<2x32xf32>
    %c0_17 = arith.constant 0 : index
    %c0_18 = arith.constant 0 : index
    %14 = vector.load %arg10[%c0_17, %c0_18] : memref<2x32xf32, #tpu.memory_space<vmem>>, vector<2x32xf32>
    tpu.vector_store %arg10[%c0_17, %c0_18], %13 {strides = array<i32>} : memref<2x32xf32, #tpu.memory_space<vmem>>, vector<2x32xf32>,
    %c0_19 = arith.constant 0 : index
    %c0_20 = arith.constant 0 : index
    %15 = vector.load %arg6[%c0_19, %c0_20] : memref<16x256xf32, #tpu.memory_space<vmem>>, vector<2x128xf32>
    %c14 = arith.constant 14 : index
    %c128 = arith.constant 128 : index
    %16 = vector.load %arg6[%c14, %c128] : memref<16x256xf32, #tpu.memory_space<vmem>>, vector<2x128xf32>
    %c0_21 = arith.constant 0 : index
    %c0_22 = arith.constant 0 : index
    %17 = vector.load %arg7[%c0_21, %c0_22] : memref<2x32xf32, #tpu.memory_space<vmem>>, vector<2x32xf32>
    %c0_23 = arith.constant 0 : index
    %c0_24 = arith.constant 0 : index
    %18 = vector.load %arg2[%c0_23, %c0_24] : memref<32x128xf32, #tpu.memory_space<vmem>>, vector<32x128xf32>
    %cst_25 = arith.constant dense<0.000000e+00> : vector<2x128xf32>
    %19 = tpu.matmul %17, %18, %cst_25 {dimension_numbers = #tpu.dot_dimension_numbers<[1], [0], [0], [1], [0, 0, 1, 1], [], []>} : vector<2x32xf32>, vector<32x128xf32>, vector<2x128xf32> -> vector<2x128xf32>
    %20 = arith.addf %15, %19 : vector<2x128xf32>
    %c0_26 = arith.constant 0 : index
    %c0_27 = arith.constant 0 : index
    %21 = vector.load %arg9[%c0_26, %c0_27] : memref<2x32xf32, #tpu.memory_space<vmem>>, vector<2x32xf32>
    %c0_28 = arith.constant 0 : index
    %c0_29 = arith.constant 0 : index
    %22 = vector.load %arg3[%c0_28, %c0_29] : memref<32x128xf32, #tpu.memory_space<vmem>>, vector<32x128xf32>
    %cst_30 = arith.constant dense<0.000000e+00> : vector<2x128xf32>
    %23 = tpu.matmul %21, %22, %cst_30 {dimension_numbers = #tpu.dot_dimension_numbers<[1], [0], [0], [1], [0, 0, 1, 1], [], []>} : vector<2x32xf32>, vector<32x128xf32>, vector<2x128xf32> -> vector<2x128xf32>
    %24 = arith.addf %16, %23 : vector<2x128xf32>
    %c0_31 = arith.constant 0 : index
    %c0_32 = arith.constant 0 : index
    %25 = vector.load %arg8[%c0_31, %c0_32] : memref<2x32xf32, #tpu.memory_space<vmem>>, vector<2x32xf32>
    %26 = vector.extract_strided_slice %20 {offsets = [0, 0], sizes = [2, 32], strides = [1, 1]} : vector<2x128xf32> to vector<2x32xf32>
    %27 = arith.negf %26 : vector<2x32xf32>
    %28 = math.exp %27 : vector<2x32xf32>
    %cst_33 = arith.constant 1.000000e+00 : f32
    %29 = vector.broadcast %cst_33 : f32 to vector<2x32xf32>
    %30 = arith.addf %29, %28 : vector<2x32xf32>
    %31 = arith.divf %29, %30 : vector<2x32xf32>
    %32 = vector.extract_strided_slice %20 {offsets = [0, 32], sizes = [2, 32], strides = [1, 1]} : vector<2x128xf32> to vector<2x32xf32>
    %33 = arith.negf %32 : vector<2x32xf32>
    %34 = math.exp %33 : vector<2x32xf32>
    %cst_34 = arith.constant 1.000000e+00 : f32
    %35 = vector.broadcast %cst_34 : f32 to vector<2x32xf32>
    %36 = arith.addf %35, %34 : vector<2x32xf32>
    %37 = arith.divf %35, %36 : vector<2x32xf32>
    %38 = vector.extract_strided_slice %20 {offsets = [0, 64], sizes = [2, 32], strides = [1, 1]} : vector<2x128xf32> to vector<2x32xf32>
    %39 = math.tanh %38 : vector<2x32xf32>
    %40 = vector.extract_strided_slice %20 {offsets = [0, 96], sizes = [2, 32], strides = [1, 1]} : vector<2x128xf32> to vector<2x32xf32>
    %41 = arith.negf %40 : vector<2x32xf32>
    %42 = math.exp %41 : vector<2x32xf32>
    %cst_35 = arith.constant 1.000000e+00 : f32
    %43 = vector.broadcast %cst_35 : f32 to vector<2x32xf32>
    %44 = arith.addf %43, %42 : vector<2x32xf32>
    %45 = arith.divf %43, %44 : vector<2x32xf32>
    %46 = arith.mulf %37, %25 : vector<2x32xf32>
    %47 = arith.mulf %31, %39 : vector<2x32xf32>
    %48 = arith.addf %46, %47 : vector<2x32xf32>
    %49 = math.tanh %48 : vector<2x32xf32>
    %50 = arith.mulf %45, %49 : vector<2x32xf32>
    %c0_36 = arith.constant 0 : index
    %c0_37 = arith.constant 0 : index
    %51 = vector.load %arg10[%c0_36, %c0_37] : memref<2x32xf32, #tpu.memory_space<vmem>>, vector<2x32xf32>
    %52 = vector.extract_strided_slice %24 {offsets = [0, 0], sizes = [2, 32], strides = [1, 1]} : vector<2x128xf32> to vector<2x32xf32>
    %53 = arith.negf %52 : vector<2x32xf32>
    %54 = math.exp %53 : vector<2x32xf32>
    %cst_38 = arith.constant 1.000000e+00 : f32
    %55 = vector.broadcast %cst_38 : f32 to vector<2x32xf32>
    %56 = arith.addf %55, %54 : vector<2x32xf32>
    %57 = arith.divf %55, %56 : vector<2x32xf32>
    %58 = vector.extract_strided_slice %24 {offsets = [0, 32], sizes = [2, 32], strides = [1, 1]} : vector<2x128xf32> to vector<2x32xf32>
    %59 = arith.negf %58 : vector<2x32xf32>
    %60 = math.exp %59 : vector<2x32xf32>
    %cst_39 = arith.constant 1.000000e+00 : f32
    %61 = vector.broadcast %cst_39 : f32 to vector<2x32xf32>
    %62 = arith.addf %61, %60 : vector<2x32xf32>
    %63 = arith.divf %61, %62 : vector<2x32xf32>
    %64 = vector.extract_strided_slice %24 {offsets = [0, 64], sizes = [2, 32], strides = [1, 1]} : vector<2x128xf32> to vector<2x32xf32>
    %65 = math.tanh %64 : vector<2x32xf32>
    %66 = vector.extract_strided_slice %24 {offsets = [0, 96], sizes = [2, 32], strides = [1, 1]} : vector<2x128xf32> to vector<2x32xf32>
    %67 = arith.negf %66 : vector<2x32xf32>
    %68 = math.exp %67 : vector<2x32xf32>
    %cst_40 = arith.constant 1.000000e+00 : f32
    %69 = vector.broadcast %cst_40 : f32 to vector<2x32xf32>
    %70 = arith.addf %69, %68 : vector<2x32xf32>
    %71 = arith.divf %69, %70 : vector<2x32xf32>
    %72 = arith.mulf %63, %51 : vector<2x32xf32>
    %73 = arith.mulf %57, %65 : vector<2x32xf32>
    %74 = arith.addf %72, %73 : vector<2x32xf32>
    %75 = math.tanh %74 : vector<2x32xf32>
    %76 = arith.mulf %71, %75 : vector<2x32xf32>
    %c0_41 = arith.constant 0 : index
    %c0_42 = arith.constant 0 : index
    %77 = vector.load %arg7[%c0_41, %c0_42] : memref<2x32xf32, #tpu.memory_space<vmem>>, vector<2x32xf32>
    tpu.vector_store %arg7[%c0_41, %c0_42], %50 {strides = array<i32>} : memref<2x32xf32, #tpu.memory_space<vmem>>, vector<2x32xf32>,
    %c0_43 = arith.constant 0 : index
    %c0_44 = arith.constant 0 : index
    %78 = vector.load %arg8[%c0_43, %c0_44] : memref<2x32xf32, #tpu.memory_space<vmem>>, vector<2x32xf32>
    tpu.vector_store %arg8[%c0_43, %c0_44], %48 {strides = array<i32>} : memref<2x32xf32, #tpu.memory_space<vmem>>, vector<2x32xf32>,
    %c0_45 = arith.constant 0 : index
    %c0_46 = arith.constant 0 : index
    %79 = vector.load %arg9[%c0_45, %c0_46] : memref<2x32xf32, #tpu.memory_space<vmem>>, vector<2x32xf32>
    tpu.vector_store %arg9[%c0_45, %c0_46], %76 {strides = array<i32>} : memref<2x32xf32, #tpu.memory_space<vmem>>, vector<2x32xf32>,
    %c0_47 = arith.constant 0 : index
    %c0_48 = arith.constant 0 : index
    %80 = vector.load %arg10[%c0_47, %c0_48] : memref<2x32xf32, #tpu.memory_space<vmem>>, vector<2x32xf32>
    tpu.vector_store %arg10[%c0_47, %c0_48], %74 {strides = array<i32>} : memref<2x32xf32, #tpu.memory_space<vmem>>, vector<2x32xf32>,
    %c0_49 = arith.constant 0 : index
    %c0_50 = arith.constant 0 : index
    %81 = vector.load %arg5[%c0_49, %c0_50] : memref<16x64xf32, #tpu.memory_space<vmem>>, vector<2x32xf32>
    tpu.vector_store %arg5[%c0_49, %c0_50], %50 {strides = array<i32>} : memref<16x64xf32, #tpu.memory_space<vmem>>, vector<2x32xf32>,
    %c14_51 = arith.constant 14 : index
    %c32 = arith.constant 32 : index
    %82 = vector.load %arg5[%c14_51, %c32] : memref<16x64xf32, #tpu.memory_space<vmem>>, vector<2x32xf32>
    tpu.vector_store %arg5[%c14_51, %c32], %76 {strides = array<i32>} : memref<16x64xf32, #tpu.memory_space<vmem>>, vector<2x32xf32>,
    %c2 = arith.constant 2 : index
    %c0_52 = arith.constant 0 : index
    %83 = vector.load %arg6[%c2, %c0_52] : memref<16x256xf32, #tpu.memory_space<vmem>>, vector<2x128xf32>
    %c12 = arith.constant 12 : index
    %c128_53 = arith.constant 128 : index
    %84 = vector.load %arg6[%c12, %c128_53] : memref<16x256xf32, #tpu.memory_space<vmem>>, vector<2x128xf32>
    %c0_54 = arith.constant 0 : index
    %c0_55 = arith.constant 0 : index
    %85 = vector.load %arg7[%c0_54, %c0_55] : memref<2x32xf32, #tpu.memory_space<vmem>>, vector<2x32xf32>
    %c0_56 = arith.constant 0 : index
    %c0_57 = arith.constant 0 : index
    %86 = vector.load %arg2[%c0_56, %c0_57] : memref<32x128xf32, #tpu.memory_space<vmem>>, vector<32x128xf32>
    %cst_58 = arith.constant dense<0.000000e+00> : vector<2x128xf32>
    %87 = tpu.matmul %85, %86, %cst_58 {dimension_numbers = #tpu.dot_dimension_numbers<[1], [0], [0], [1], [0, 0, 1, 1], [], []>} : vector<2x32xf32>, vector<32x128xf32>, vector<2x128xf32> -> vector<2x128xf32>
    %88 = arith.addf %83, %87 : vector<2x128xf32>
    %c0_59 = arith.constant 0 : index
    %c0_60 = arith.constant 0 : index
    %89 = vector.load %arg9[%c0_59, %c0_60] : memref<2x32xf32, #tpu.memory_space<vmem>>, vector<2x32xf32>
    %c0_61 = arith.constant 0 : index
    %c0_62 = arith.constant 0 : index
    %90 = vector.load %arg3[%c0_61, %c0_62] : memref<32x128xf32, #tpu.memory_space<vmem>>, vector<32x128xf32>
    %cst_63 = arith.constant dense<0.000000e+00> : vector<2x128xf32>
    %91 = tpu.matmul %89, %90, %cst_63 {dimension_numbers = #tpu.dot_dimension_numbers<[1], [0], [0], [1], [0, 0, 1, 1], [], []>} : vector<2x32xf32>, vector<32x128xf32>, vector<2x128xf32> -> vector<2x128xf32>
    %92 = arith.addf %84, %91 : vector<2x128xf32>
    %c0_64 = arith.constant 0 : index
    %c0_65 = arith.constant 0 : index
    %93 = vector.load %arg8[%c0_64, %c0_65] : memref<2x32xf32, #tpu.memory_space<vmem>>, vector<2x32xf32>
    %94 = vector.extract_strided_slice %88 {offsets = [0, 0], sizes = [2, 32], strides = [1, 1]} : vector<2x128xf32> to vector<2x32xf32>
    %95 = arith.negf %94 : vector<2x32xf32>
    %96 = math.exp %95 : vector<2x32xf32>
    %cst_66 = arith.constant 1.000000e+00 : f32
    %97 = vector.broadcast %cst_66 : f32 to vector<2x32xf32>
    %98 = arith.addf %97, %96 : vector<2x32xf32>
    %99 = arith.divf %97, %98 : vector<2x32xf32>
    %100 = vector.extract_strided_slice %88 {offsets = [0, 32], sizes = [2, 32], strides = [1, 1]} : vector<2x128xf32> to vector<2x32xf32>
    %101 = arith.negf %100 : vector<2x32xf32>
    %102 = math.exp %101 : vector<2x32xf32>
    %cst_67 = arith.constant 1.000000e+00 : f32
    %103 = vector.broadcast %cst_67 : f32 to vector<2x32xf32>
    %104 = arith.addf %103, %102 : vector<2x32xf32>
    %105 = arith.divf %103, %104 : vector<2x32xf32>
    %106 = vector.extract_strided_slice %88 {offsets = [0, 64], sizes = [2, 32], strides = [1, 1]} : vector<2x128xf32> to vector<2x32xf32>
    %107 = math.tanh %106 : vector<2x32xf32>
    %108 = vector.extract_strided_slice %88 {offsets = [0, 96], sizes = [2, 32], strides = [1, 1]} : vector<2x128xf32> to vector<2x32xf32>
    %109 = arith.negf %108 : vector<2x32xf32>
    %110 = math.exp %109 : vector<2x32xf32>
    %cst_68 = arith.constant 1.000000e+00 : f32
    %111 = vector.broadcast %cst_68 : f32 to vector<2x32xf32>
    %112 = arith.addf %111, %110 : vector<2x32xf32>
    %113 = arith.divf %111, %112 : vector<2x32xf32>
    %114 = arith.mulf %105, %93 : vector<2x32xf32>
    %115 = arith.mulf %99, %107 : vector<2x32xf32>
    %116 = arith.addf %114, %115 : vector<2x32xf32>
    %117 = math.tanh %116 : vector<2x32xf32>
    %118 = arith.mulf %113, %117 : vector<2x32xf32>
    %c0_69 = arith.constant 0 : index
    %c0_70 = arith.constant 0 : index
    %119 = vector.load %arg10[%c0_69, %c0_70] : memref<2x32xf32, #tpu.memory_space<vmem>>, vector<2x32xf32>
    %120 = vector.extract_strided_slice %92 {offsets = [0, 0], sizes = [2, 32], strides = [1, 1]} : vector<2x128xf32> to vector<2x32xf32>
    %121 = arith.negf %120 : vector<2x32xf32>
    %122 = math.exp %121 : vector<2x32xf32>
    %cst_71 = arith.constant 1.000000e+00 : f32
    %123 = vector.broadcast %cst_71 : f32 to vector<2x32xf32>
    %124 = arith.addf %123, %122 : vector<2x32xf32>
    %125 = arith.divf %123, %124 : vector<2x32xf32>
    %126 = vector.extract_strided_slice %92 {offsets = [0, 32], sizes = [2, 32], strides = [1, 1]} : vector<2x128xf32> to vector<2x32xf32>
    %127 = arith.negf %126 : vector<2x32xf32>
    %128 = math.exp %127 : vector<2x32xf32>
    %cst_72 = arith.constant 1.000000e+00 : f32
    %129 = vector.broadcast %cst_72 : f32 to vector<2x32xf32>
    %130 = arith.addf %129, %128 : vector<2x32xf32>
    %131 = arith.divf %129, %130 : vector<2x32xf32>
    %132 = vector.extract_strided_slice %92 {offsets = [0, 64], sizes = [2, 32], strides = [1, 1]} : vector<2x128xf32> to vector<2x32xf32>
    %133 = math.tanh %132 : vector<2x32xf32>
    %134 = vector.extract_strided_slice %92 {offsets = [0, 96], sizes = [2, 32], strides = [1, 1]} : vector<2x128xf32> to vector<2x32xf32>
    %135 = arith.negf %134 : vector<2x32xf32>
    %136 = math.exp %135 : vector<2x32xf32>
    %cst_73 = arith.constant 1.000000e+00 : f32
    %137 = vector.broadcast %cst_73 : f32 to vector<2x32xf32>
    %138 = arith.addf %137, %136 : vector<2x32xf32>
    %139 = arith.divf %137, %138 : vector<2x32xf32>
    %140 = arith.mulf %131, %119 : vector<2x32xf32>
    %141 = arith.mulf %125, %133 : vector<2x32xf32>
    %142 = arith.addf %140, %141 : vector<2x32xf32>
    %143 = math.tanh %142 : vector<2x32xf32>
    %144 = arith.mulf %139, %143 : vector<2x32xf32>
    %c0_74 = arith.constant 0 : index
    %c0_75 = arith.constant 0 : index
    %145 = vector.load %arg7[%c0_74, %c0_75] : memref<2x32xf32, #tpu.memory_space<vmem>>, vector<2x32xf32>
    tpu.vector_store %arg7[%c0_74, %c0_75], %118 {strides = array<i32>} : memref<2x32xf32, #tpu.memory_space<vmem>>, vector<2x32xf32>,
    %c0_76 = arith.constant 0 : index
    %c0_77 = arith.constant 0 : index
    %146 = vector.load %arg8[%c0_76, %c0_77] : memref<2x32xf32, #tpu.memory_space<vmem>>, vector<2x32xf32>
    tpu.vector_store %arg8[%c0_76, %c0_77], %116 {strides = array<i32>} : memref<2x32xf32, #tpu.memory_space<vmem>>, vector<2x32xf32>,
    %c0_78 = arith.constant 0 : index
    %c0_79 = arith.constant 0 : index
    %147 = vector.load %arg9[%c0_78, %c0_79] : memref<2x32xf32, #tpu.memory_space<vmem>>, vector<2x32xf32>
    tpu.vector_store %arg9[%c0_78, %c0_79], %144 {strides = array<i32>} : memref<2x32xf32, #tpu.memory_space<vmem>>, vector<2x32xf32>,
    %c0_80 = arith.constant 0 : index
    %c0_81 = arith.constant 0 : index
    %148 = vector.load %arg10[%c0_80, %c0_81] : memref<2x32xf32, #tpu.memory_space<vmem>>, vector<2x32xf32>
    tpu.vector_store %arg10[%c0_80, %c0_81], %142 {strides = array<i32>} : memref<2x32xf32, #tpu.memory_space<vmem>>, vector<2x32xf32>,
    %c2_82 = arith.constant 2 : index
    %c0_83 = arith.constant 0 : index
    %149 = vector.load %arg5[%c2_82, %c0_83] : memref<16x64xf32, #tpu.memory_space<vmem>>, vector<2x32xf32>
    tpu.vector_store %arg5[%c2_82, %c0_83], %118 {strides = array<i32>} : memref<16x64xf32, #tpu.memory_space<vmem>>, vector<2x32xf32>,
    %c12_84 = arith.constant 12 : index
    %c32_85 = arith.constant 32 : index
    %150 = vector.load %arg5[%c12_84, %c32_85] : memref<16x64xf32, #tpu.memory_space<vmem>>, vector<2x32xf32>
    tpu.vector_store %arg5[%c12_84, %c32_85], %144 {strides = array<i32>} : memref<16x64xf32, #tpu.memory_space<vmem>>, vector<2x32xf32>,
    %c4 = arith.constant 4 : index
    %c0_86 = arith.constant 0 : index
    %151 = vector.load %arg6[%c4, %c0_86] : memref<16x256xf32, #tpu.memory_space<vmem>>, vector<2x128xf32>
    %c10 = arith.constant 10 : index
    %c128_87 = arith.constant 128 : index
    %152 = vector.load %arg6[%c10, %c128_87] : memref<16x256xf32, #tpu.memory_space<vmem>>, vector<2x128xf32>
    %c0_88 = arith.constant 0 : index
    %c0_89 = arith.constant 0 : index
    %153 = vector.load %arg7[%c0_88, %c0_89] : memref<2x32xf32, #tpu.memory_space<vmem>>, vector<2x32xf32>
    %c0_90 = arith.constant 0 : index
    %c0_91 = arith.constant 0 : index
    %154 = vector.load %arg2[%c0_90, %c0_91] : memref<32x128xf32, #tpu.memory_space<vmem>>, vector<32x128xf32>
    %cst_92 = arith.constant dense<0.000000e+00> : vector<2x128xf32>
    %155 = tpu.matmul %153, %154, %cst_92 {dimension_numbers = #tpu.dot_dimension_numbers<[1], [0], [0], [1], [0, 0, 1, 1], [], []>} : vector<2x32xf32>, vector<32x128xf32>, vector<2x128xf32> -> vector<2x128xf32>
    %156 = arith.addf %151, %155 : vector<2x128xf32>
    %c0_93 = arith.constant 0 : index
    %c0_94 = arith.constant 0 : index
    %157 = vector.load %arg9[%c0_93, %c0_94] : memref<2x32xf32, #tpu.memory_space<vmem>>, vector<2x32xf32>
    %c0_95 = arith.constant 0 : index
    %c0_96 = arith.constant 0 : index
    %158 = vector.load %arg3[%c0_95, %c0_96] : memref<32x128xf32, #tpu.memory_space<vmem>>, vector<32x128xf32>
    %cst_97 = arith.constant dense<0.000000e+00> : vector<2x128xf32>
    %159 = tpu.matmul %157, %158, %cst_97 {dimension_numbers = #tpu.dot_dimension_numbers<[1], [0], [0], [1], [0, 0, 1, 1], [], []>} : vector<2x32xf32>, vector<32x128xf32>, vector<2x128xf32> -> vector<2x128xf32>
    %160 = arith.addf %152, %159 : vector<2x128xf32>
    %c0_98 = arith.constant 0 : index
    %c0_99 = arith.constant 0 : index
    %161 = vector.load %arg8[%c0_98, %c0_99] : memref<2x32xf32, #tpu.memory_space<vmem>>, vector<2x32xf32>
    %162 = vector.extract_strided_slice %156 {offsets = [0, 0], sizes = [2, 32], strides = [1, 1]} : vector<2x128xf32> to vector<2x32xf32>
    %163 = arith.negf %162 : vector<2x32xf32>
    %164 = math.exp %163 : vector<2x32xf32>
    %cst_100 = arith.constant 1.000000e+00 : f32
    %165 = vector.broadcast %cst_100 : f32 to vector<2x32xf32>
    %166 = arith.addf %165, %164 : vector<2x32xf32>
    %167 = arith.divf %165, %166 : vector<2x32xf32>
    %168 = vector.extract_strided_slice %156 {offsets = [0, 32], sizes = [2, 32], strides = [1, 1]} : vector<2x128xf32> to vector<2x32xf32>
    %169 = arith.negf %168 : vector<2x32xf32>
    %170 = math.exp %169 : vector<2x32xf32>
    %cst_101 = arith.constant 1.000000e+00 : f32
    %171 = vector.broadcast %cst_101 : f32 to vector<2x32xf32>
    %172 = arith.addf %171, %170 : vector<2x32xf32>
    %173 = arith.divf %171, %172 : vector<2x32xf32>
    %174 = vector.extract_strided_slice %156 {offsets = [0, 64], sizes = [2, 32], strides = [1, 1]} : vector<2x128xf32> to vector<2x32xf32>
    %175 = math.tanh %174 : vector<2x32xf32>
    %176 = vector.extract_strided_slice %156 {offsets = [0, 96], sizes = [2, 32], strides = [1, 1]} : vector<2x128xf32> to vector<2x32xf32>
    %177 = arith.negf %176 : vector<2x32xf32>
    %178 = math.exp %177 : vector<2x32xf32>
    %cst_102 = arith.constant 1.000000e+00 : f32
    %179 = vector.broadcast %cst_102 : f32 to vector<2x32xf32>
    %180 = arith.addf %179, %178 : vector<2x32xf32>
    %181 = arith.divf %179, %180 : vector<2x32xf32>
    %182 = arith.mulf %173, %161 : vector<2x32xf32>
    %183 = arith.mulf %167, %175 : vector<2x32xf32>
    %184 = arith.addf %182, %183 : vector<2x32xf32>
    %185 = math.tanh %184 : vector<2x32xf32>
    %186 = arith.mulf %181, %185 : vector<2x32xf32>
    %c0_103 = arith.constant 0 : index
    %c0_104 = arith.constant 0 : index
    %187 = vector.load %arg10[%c0_103, %c0_104] : memref<2x32xf32, #tpu.memory_space<vmem>>, vector<2x32xf32>
    %188 = vector.extract_strided_slice %160 {offsets = [0, 0], sizes = [2, 32], strides = [1, 1]} : vector<2x128xf32> to vector<2x32xf32>
    %189 = arith.negf %188 : vector<2x32xf32>
    %190 = math.exp %189 : vector<2x32xf32>
    %cst_105 = arith.constant 1.000000e+00 : f32
    %191 = vector.broadcast %cst_105 : f32 to vector<2x32xf32>
    %192 = arith.addf %191, %190 : vector<2x32xf32>
    %193 = arith.divf %191, %192 : vector<2x32xf32>
    %194 = vector.extract_strided_slice %160 {offsets = [0, 32], sizes = [2, 32], strides = [1, 1]} : vector<2x128xf32> to vector<2x32xf32>
    %195 = arith.negf %194 : vector<2x32xf32>
    %196 = math.exp %195 : vector<2x32xf32>
    %cst_106 = arith.constant 1.000000e+00 : f32
    %197 = vector.broadcast %cst_106 : f32 to vector<2x32xf32>
    %198 = arith.addf %197, %196 : vector<2x32xf32>
    %199 = arith.divf %197, %198 : vector<2x32xf32>
    %200 = vector.extract_strided_slice %160 {offsets = [0, 64], sizes = [2, 32], strides = [1, 1]} : vector<2x128xf32> to vector<2x32xf32>
    %201 = math.tanh %200 : vector<2x32xf32>
    %202 = vector.extract_strided_slice %160 {offsets = [0, 96], sizes = [2, 32], strides = [1, 1]} : vector<2x128xf32> to vector<2x32xf32>
    %203 = arith.negf %202 : vector<2x32xf32>
    %204 = math.exp %203 : vector<2x32xf32>
    %cst_107 = arith.constant 1.000000e+00 : f32
    %205 = vector.broadcast %cst_107 : f32 to vector<2x32xf32>
    %206 = arith.addf %205, %204 : vector<2x32xf32>
    %207 = arith.divf %205, %206 : vector<2x32xf32>
    %208 = arith.mulf %199, %187 : vector<2x32xf32>
    %209 = arith.mulf %193, %201 : vector<2x32xf32>
    %210 = arith.addf %208, %209 : vector<2x32xf32>
    %211 = math.tanh %210 : vector<2x32xf32>
    %212 = arith.mulf %207, %211 : vector<2x32xf32>
    %c0_108 = arith.constant 0 : index
    %c0_109 = arith.constant 0 : index
    %213 = vector.load %arg7[%c0_108, %c0_109] : memref<2x32xf32, #tpu.memory_space<vmem>>, vector<2x32xf32>
    tpu.vector_store %arg7[%c0_108, %c0_109], %186 {strides = array<i32>} : memref<2x32xf32, #tpu.memory_space<vmem>>, vector<2x32xf32>,
    %c0_110 = arith.constant 0 : index
    %c0_111 = arith.constant 0 : index
    %214 = vector.load %arg8[%c0_110, %c0_111] : memref<2x32xf32, #tpu.memory_space<vmem>>, vector<2x32xf32>
    tpu.vector_store %arg8[%c0_110, %c0_111], %184 {strides = array<i32>} : memref<2x32xf32, #tpu.memory_space<vmem>>, vector<2x32xf32>,
    %c0_112 = arith.constant 0 : index
    %c0_113 = arith.constant 0 : index
    %215 = vector.load %arg9[%c0_112, %c0_113] : memref<2x32xf32, #tpu.memory_space<vmem>>, vector<2x32xf32>
    tpu.vector_store %arg9[%c0_112, %c0_113], %212 {strides = array<i32>} : memref<2x32xf32, #tpu.memory_space<vmem>>, vector<2x32xf32>,
    %c0_114 = arith.constant 0 : index
    %c0_115 = arith.constant 0 : index
    %216 = vector.load %arg10[%c0_114, %c0_115] : memref<2x32xf32, #tpu.memory_space<vmem>>, vector<2x32xf32>
    tpu.vector_store %arg10[%c0_114, %c0_115], %210 {strides = array<i32>} : memref<2x32xf32, #tpu.memory_space<vmem>>, vector<2x32xf32>,
    %c4_116 = arith.constant 4 : index
    %c0_117 = arith.constant 0 : index
    %217 = vector.load %arg5[%c4_116, %c0_117] : memref<16x64xf32, #tpu.memory_space<vmem>>, vector<2x32xf32>
    tpu.vector_store %arg5[%c4_116, %c0_117], %186 {strides = array<i32>} : memref<16x64xf32, #tpu.memory_space<vmem>>, vector<2x32xf32>,
    %c10_118 = arith.constant 10 : index
    %c32_119 = arith.constant 32 : index
    %218 = vector.load %arg5[%c10_118, %c32_119] : memref<16x64xf32, #tpu.memory_space<vmem>>, vector<2x32xf32>
    tpu.vector_store %arg5[%c10_118, %c32_119], %212 {strides = array<i32>} : memref<16x64xf32, #tpu.memory_space<vmem>>, vector<2x32xf32>,
    %c6 = arith.constant 6 : index
    %c0_120 = arith.constant 0 : index
    %219 = vector.load %arg6[%c6, %c0_120] : memref<16x256xf32, #tpu.memory_space<vmem>>, vector<2x128xf32>
    %c8 = arith.constant 8 : index
    %c128_121 = arith.constant 128 : index
    %220 = vector.load %arg6[%c8, %c128_121] : memref<16x256xf32, #tpu.memory_space<vmem>>, vector<2x128xf32>
    %c0_122 = arith.constant 0 : index
    %c0_123 = arith.constant 0 : index
    %221 = vector.load %arg7[%c0_122, %c0_123] : memref<2x32xf32, #tpu.memory_space<vmem>>, vector<2x32xf32>
    %c0_124 = arith.constant 0 : index
    %c0_125 = arith.constant 0 : index
    %222 = vector.load %arg2[%c0_124, %c0_125] : memref<32x128xf32, #tpu.memory_space<vmem>>, vector<32x128xf32>
    %cst_126 = arith.constant dense<0.000000e+00> : vector<2x128xf32>
    %223 = tpu.matmul %221, %222, %cst_126 {dimension_numbers = #tpu.dot_dimension_numbers<[1], [0], [0], [1], [0, 0, 1, 1], [], []>} : vector<2x32xf32>, vector<32x128xf32>, vector<2x128xf32> -> vector<2x128xf32>
    %224 = arith.addf %219, %223 : vector<2x128xf32>
    %c0_127 = arith.constant 0 : index
    %c0_128 = arith.constant 0 : index
    %225 = vector.load %arg9[%c0_127, %c0_128] : memref<2x32xf32, #tpu.memory_space<vmem>>, vector<2x32xf32>
    %c0_129 = arith.constant 0 : index
    %c0_130 = arith.constant 0 : index
    %226 = vector.load %arg3[%c0_129, %c0_130] : memref<32x128xf32, #tpu.memory_space<vmem>>, vector<32x128xf32>
    %cst_131 = arith.constant dense<0.000000e+00> : vector<2x128xf32>
    %227 = tpu.matmul %225, %226, %cst_131 {dimension_numbers = #tpu.dot_dimension_numbers<[1], [0], [0], [1], [0, 0, 1, 1], [], []>} : vector<2x32xf32>, vector<32x128xf32>, vector<2x128xf32> -> vector<2x128xf32>
    %228 = arith.addf %220, %227 : vector<2x128xf32>
    %c0_132 = arith.constant 0 : index
    %c0_133 = arith.constant 0 : index
    %229 = vector.load %arg8[%c0_132, %c0_133] : memref<2x32xf32, #tpu.memory_space<vmem>>, vector<2x32xf32>
    %230 = vector.extract_strided_slice %224 {offsets = [0, 0], sizes = [2, 32], strides = [1, 1]} : vector<2x128xf32> to vector<2x32xf32>
    %231 = arith.negf %230 : vector<2x32xf32>
    %232 = math.exp %231 : vector<2x32xf32>
    %cst_134 = arith.constant 1.000000e+00 : f32
    %233 = vector.broadcast %cst_134 : f32 to vector<2x32xf32>
    %234 = arith.addf %233, %232 : vector<2x32xf32>
    %235 = arith.divf %233, %234 : vector<2x32xf32>
    %236 = vector.extract_strided_slice %224 {offsets = [0, 32], sizes = [2, 32], strides = [1, 1]} : vector<2x128xf32> to vector<2x32xf32>
    %237 = arith.negf %236 : vector<2x32xf32>
    %238 = math.exp %237 : vector<2x32xf32>
    %cst_135 = arith.constant 1.000000e+00 : f32
    %239 = vector.broadcast %cst_135 : f32 to vector<2x32xf32>
    %240 = arith.addf %239, %238 : vector<2x32xf32>
    %241 = arith.divf %239, %240 : vector<2x32xf32>
    %242 = vector.extract_strided_slice %224 {offsets = [0, 64], sizes = [2, 32], strides = [1, 1]} : vector<2x128xf32> to vector<2x32xf32>
    %243 = math.tanh %242 : vector<2x32xf32>
    %244 = vector.extract_strided_slice %224 {offsets = [0, 96], sizes = [2, 32], strides = [1, 1]} : vector<2x128xf32> to vector<2x32xf32>
    %245 = arith.negf %244 : vector<2x32xf32>
    %246 = math.exp %245 : vector<2x32xf32>
    %cst_136 = arith.constant 1.000000e+00 : f32
    %247 = vector.broadcast %cst_136 : f32 to vector<2x32xf32>
    %248 = arith.addf %247, %246 : vector<2x32xf32>
    %249 = arith.divf %247, %248 : vector<2x32xf32>
    %250 = arith.mulf %241, %229 : vector<2x32xf32>
    %251 = arith.mulf %235, %243 : vector<2x32xf32>
    %252 = arith.addf %250, %251 : vector<2x32xf32>
    %253 = math.tanh %252 : vector<2x32xf32>
    %254 = arith.mulf %249, %253 : vector<2x32xf32>
    %c0_137 = arith.constant 0 : index
    %c0_138 = arith.constant 0 : index
    %255 = vector.load %arg10[%c0_137, %c0_138] : memref<2x32xf32, #tpu.memory_space<vmem>>, vector<2x32xf32>
    %256 = vector.extract_strided_slice %228 {offsets = [0, 0], sizes = [2, 32], strides = [1, 1]} : vector<2x128xf32> to vector<2x32xf32>
    %257 = arith.negf %256 : vector<2x32xf32>
    %258 = math.exp %257 : vector<2x32xf32>
    %cst_139 = arith.constant 1.000000e+00 : f32
    %259 = vector.broadcast %cst_139 : f32 to vector<2x32xf32>
    %260 = arith.addf %259, %258 : vector<2x32xf32>
    %261 = arith.divf %259, %260 : vector<2x32xf32>
    %262 = vector.extract_strided_slice %228 {offsets = [0, 32], sizes = [2, 32], strides = [1, 1]} : vector<2x128xf32> to vector<2x32xf32>
    %263 = arith.negf %262 : vector<2x32xf32>
    %264 = math.exp %263 : vector<2x32xf32>
    %cst_140 = arith.constant 1.000000e+00 : f32
    %265 = vector.broadcast %cst_140 : f32 to vector<2x32xf32>
    %266 = arith.addf %265, %264 : vector<2x32xf32>
    %267 = arith.divf %265, %266 : vector<2x32xf32>
    %268 = vector.extract_strided_slice %228 {offsets = [0, 64], sizes = [2, 32], strides = [1, 1]} : vector<2x128xf32> to vector<2x32xf32>
    %269 = math.tanh %268 : vector<2x32xf32>
    %270 = vector.extract_strided_slice %228 {offsets = [0, 96], sizes = [2, 32], strides = [1, 1]} : vector<2x128xf32> to vector<2x32xf32>
    %271 = arith.negf %270 : vector<2x32xf32>
    %272 = math.exp %271 : vector<2x32xf32>
    %cst_141 = arith.constant 1.000000e+00 : f32
    %273 = vector.broadcast %cst_141 : f32 to vector<2x32xf32>
    %274 = arith.addf %273, %272 : vector<2x32xf32>
    %275 = arith.divf %273, %274 : vector<2x32xf32>
    %276 = arith.mulf %267, %255 : vector<2x32xf32>
    %277 = arith.mulf %261, %269 : vector<2x32xf32>
    %278 = arith.addf %276, %277 : vector<2x32xf32>
    %279 = math.tanh %278 : vector<2x32xf32>
    %280 = arith.mulf %275, %279 : vector<2x32xf32>
    %c0_142 = arith.constant 0 : index
    %c0_143 = arith.constant 0 : index
    %281 = vector.load %arg7[%c0_142, %c0_143] : memref<2x32xf32, #tpu.memory_space<vmem>>, vector<2x32xf32>
    tpu.vector_store %arg7[%c0_142, %c0_143], %254 {strides = array<i32>} : memref<2x32xf32, #tpu.memory_space<vmem>>, vector<2x32xf32>,
    %c0_144 = arith.constant 0 : index
    %c0_145 = arith.constant 0 : index
    %282 = vector.load %arg8[%c0_144, %c0_145] : memref<2x32xf32, #tpu.memory_space<vmem>>, vector<2x32xf32>
    tpu.vector_store %arg8[%c0_144, %c0_145], %252 {strides = array<i32>} : memref<2x32xf32, #tpu.memory_space<vmem>>, vector<2x32xf32>,
    %c0_146 = arith.constant 0 : index
    %c0_147 = arith.constant 0 : index
    %283 = vector.load %arg9[%c0_146, %c0_147] : memref<2x32xf32, #tpu.memory_space<vmem>>, vector<2x32xf32>
    tpu.vector_store %arg9[%c0_146, %c0_147], %280 {strides = array<i32>} : memref<2x32xf32, #tpu.memory_space<vmem>>, vector<2x32xf32>,
    %c0_148 = arith.constant 0 : index
    %c0_149 = arith.constant 0 : index
    %284 = vector.load %arg10[%c0_148, %c0_149] : memref<2x32xf32, #tpu.memory_space<vmem>>, vector<2x32xf32>
    tpu.vector_store %arg10[%c0_148, %c0_149], %278 {strides = array<i32>} : memref<2x32xf32, #tpu.memory_space<vmem>>, vector<2x32xf32>,
    %c6_150 = arith.constant 6 : index
    %c0_151 = arith.constant 0 : index
    %285 = vector.load %arg5[%c6_150, %c0_151] : memref<16x64xf32, #tpu.memory_space<vmem>>, vector<2x32xf32>
    tpu.vector_store %arg5[%c6_150, %c0_151], %254 {strides = array<i32>} : memref<16x64xf32, #tpu.memory_space<vmem>>, vector<2x32xf32>,
    %c8_152 = arith.constant 8 : index
    %c32_153 = arith.constant 32 : index
    %286 = vector.load %arg5[%c8_152, %c32_153] : memref<16x64xf32, #tpu.memory_space<vmem>>, vector<2x32xf32>
    tpu.vector_store %arg5[%c8_152, %c32_153], %280 {strides = array<i32>} : memref<16x64xf32, #tpu.memory_space<vmem>>, vector<2x32xf32>,
    %c8_154 = arith.constant 8 : index
    %c0_155 = arith.constant 0 : index
    %287 = vector.load %arg6[%c8_154, %c0_155] : memref<16x256xf32, #tpu.memory_space<vmem>>, vector<2x128xf32>
    %c6_156 = arith.constant 6 : index
    %c128_157 = arith.constant 128 : index
    %288 = vector.load %arg6[%c6_156, %c128_157] : memref<16x256xf32, #tpu.memory_space<vmem>>, vector<2x128xf32>
    %c0_158 = arith.constant 0 : index
    %c0_159 = arith.constant 0 : index
    %289 = vector.load %arg7[%c0_158, %c0_159] : memref<2x32xf32, #tpu.memory_space<vmem>>, vector<2x32xf32>
    %c0_160 = arith.constant 0 : index
    %c0_161 = arith.constant 0 : index
    %290 = vector.load %arg2[%c0_160, %c0_161] : memref<32x128xf32, #tpu.memory_space<vmem>>, vector<32x128xf32>
    %cst_162 = arith.constant dense<0.000000e+00> : vector<2x128xf32>
    %291 = tpu.matmul %289, %290, %cst_162 {dimension_numbers = #tpu.dot_dimension_numbers<[1], [0], [0], [1], [0, 0, 1, 1], [], []>} : vector<2x32xf32>, vector<32x128xf32>, vector<2x128xf32> -> vector<2x128xf32>
    %292 = arith.addf %287, %291 : vector<2x128xf32>
    %c0_163 = arith.constant 0 : index
    %c0_164 = arith.constant 0 : index
    %293 = vector.load %arg9[%c0_163, %c0_164] : memref<2x32xf32, #tpu.memory_space<vmem>>, vector<2x32xf32>
    %c0_165 = arith.constant 0 : index
    %c0_166 = arith.constant 0 : index
    %294 = vector.load %arg3[%c0_165, %c0_166] : memref<32x128xf32, #tpu.memory_space<vmem>>, vector<32x128xf32>
    %cst_167 = arith.constant dense<0.000000e+00> : vector<2x128xf32>
    %295 = tpu.matmul %293, %294, %cst_167 {dimension_numbers = #tpu.dot_dimension_numbers<[1], [0], [0], [1], [0, 0, 1, 1], [], []>} : vector<2x32xf32>, vector<32x128xf32>, vector<2x128xf32> -> vector<2x128xf32>
    %296 = arith.addf %288, %295 : vector<2x128xf32>
    %c0_168 = arith.constant 0 : index
    %c0_169 = arith.constant 0 : index
    %297 = vector.load %arg8[%c0_168, %c0_169] : memref<2x32xf32, #tpu.memory_space<vmem>>, vector<2x32xf32>
    %298 = vector.extract_strided_slice %292 {offsets = [0, 0], sizes = [2, 32], strides = [1, 1]} : vector<2x128xf32> to vector<2x32xf32>
    %299 = arith.negf %298 : vector<2x32xf32>
    %300 = math.exp %299 : vector<2x32xf32>
    %cst_170 = arith.constant 1.000000e+00 : f32
    %301 = vector.broadcast %cst_170 : f32 to vector<2x32xf32>
    %302 = arith.addf %301, %300 : vector<2x32xf32>
    %303 = arith.divf %301, %302 : vector<2x32xf32>
    %304 = vector.extract_strided_slice %292 {offsets = [0, 32], sizes = [2, 32], strides = [1, 1]} : vector<2x128xf32> to vector<2x32xf32>
    %305 = arith.negf %304 : vector<2x32xf32>
    %306 = math.exp %305 : vector<2x32xf32>
    %cst_171 = arith.constant 1.000000e+00 : f32
    %307 = vector.broadcast %cst_171 : f32 to vector<2x32xf32>
    %308 = arith.addf %307, %306 : vector<2x32xf32>
    %309 = arith.divf %307, %308 : vector<2x32xf32>
    %310 = vector.extract_strided_slice %292 {offsets = [0, 64], sizes = [2, 32], strides = [1, 1]} : vector<2x128xf32> to vector<2x32xf32>
    %311 = math.tanh %310 : vector<2x32xf32>
    %312 = vector.extract_strided_slice %292 {offsets = [0, 96], sizes = [2, 32], strides = [1, 1]} : vector<2x128xf32> to vector<2x32xf32>
    %313 = arith.negf %312 : vector<2x32xf32>
    %314 = math.exp %313 : vector<2x32xf32>
    %cst_172 = arith.constant 1.000000e+00 : f32
    %315 = vector.broadcast %cst_172 : f32 to vector<2x32xf32>
    %316 = arith.addf %315, %314 : vector<2x32xf32>
    %317 = arith.divf %315, %316 : vector<2x32xf32>
    %318 = arith.mulf %309, %297 : vector<2x32xf32>
    %319 = arith.mulf %303, %311 : vector<2x32xf32>
    %320 = arith.addf %318, %319 : vector<2x32xf32>
    %321 = math.tanh %320 : vector<2x32xf32>
    %322 = arith.mulf %317, %321 : vector<2x32xf32>
    %c0_173 = arith.constant 0 : index
    %c0_174 = arith.constant 0 : index
    %323 = vector.load %arg10[%c0_173, %c0_174] : memref<2x32xf32, #tpu.memory_space<vmem>>, vector<2x32xf32>
    %324 = vector.extract_strided_slice %296 {offsets = [0, 0], sizes = [2, 32], strides = [1, 1]} : vector<2x128xf32> to vector<2x32xf32>
    %325 = arith.negf %324 : vector<2x32xf32>
    %326 = math.exp %325 : vector<2x32xf32>
    %cst_175 = arith.constant 1.000000e+00 : f32
    %327 = vector.broadcast %cst_175 : f32 to vector<2x32xf32>
    %328 = arith.addf %327, %326 : vector<2x32xf32>
    %329 = arith.divf %327, %328 : vector<2x32xf32>
    %330 = vector.extract_strided_slice %296 {offsets = [0, 32], sizes = [2, 32], strides = [1, 1]} : vector<2x128xf32> to vector<2x32xf32>
    %331 = arith.negf %330 : vector<2x32xf32>
    %332 = math.exp %331 : vector<2x32xf32>
    %cst_176 = arith.constant 1.000000e+00 : f32
    %333 = vector.broadcast %cst_176 : f32 to vector<2x32xf32>
    %334 = arith.addf %333, %332 : vector<2x32xf32>
    %335 = arith.divf %333, %334 : vector<2x32xf32>
    %336 = vector.extract_strided_slice %296 {offsets = [0, 64], sizes = [2, 32], strides = [1, 1]} : vector<2x128xf32> to vector<2x32xf32>
    %337 = math.tanh %336 : vector<2x32xf32>
    %338 = vector.extract_strided_slice %296 {offsets = [0, 96], sizes = [2, 32], strides = [1, 1]} : vector<2x128xf32> to vector<2x32xf32>
    %339 = arith.negf %338 : vector<2x32xf32>
    %340 = math.exp %339 : vector<2x32xf32>
    %cst_177 = arith.constant 1.000000e+00 : f32
    %341 = vector.broadcast %cst_177 : f32 to vector<2x32xf32>
    %342 = arith.addf %341, %340 : vector<2x32xf32>
    %343 = arith.divf %341, %342 : vector<2x32xf32>
    %344 = arith.mulf %335, %323 : vector<2x32xf32>
    %345 = arith.mulf %329, %337 : vector<2x32xf32>
    %346 = arith.addf %344, %345 : vector<2x32xf32>
    %347 = math.tanh %346 : vector<2x32xf32>
    %348 = arith.mulf %343, %347 : vector<2x32xf32>
    %c0_178 = arith.constant 0 : index
    %c0_179 = arith.constant 0 : index
    %349 = vector.load %arg7[%c0_178, %c0_179] : memref<2x32xf32, #tpu.memory_space<vmem>>, vector<2x32xf32>
    tpu.vector_store %arg7[%c0_178, %c0_179], %322 {strides = array<i32>} : memref<2x32xf32, #tpu.memory_space<vmem>>, vector<2x32xf32>,
    %c0_180 = arith.constant 0 : index
    %c0_181 = arith.constant 0 : index
    %350 = vector.load %arg8[%c0_180, %c0_181] : memref<2x32xf32, #tpu.memory_space<vmem>>, vector<2x32xf32>
    tpu.vector_store %arg8[%c0_180, %c0_181], %320 {strides = array<i32>} : memref<2x32xf32, #tpu.memory_space<vmem>>, vector<2x32xf32>,
    %c0_182 = arith.constant 0 : index
    %c0_183 = arith.constant 0 : index
    %351 = vector.load %arg9[%c0_182, %c0_183] : memref<2x32xf32, #tpu.memory_space<vmem>>, vector<2x32xf32>
    tpu.vector_store %arg9[%c0_182, %c0_183], %348 {strides = array<i32>} : memref<2x32xf32, #tpu.memory_space<vmem>>, vector<2x32xf32>,
    %c0_184 = arith.constant 0 : index
    %c0_185 = arith.constant 0 : index
    %352 = vector.load %arg10[%c0_184, %c0_185] : memref<2x32xf32, #tpu.memory_space<vmem>>, vector<2x32xf32>
    tpu.vector_store %arg10[%c0_184, %c0_185], %346 {strides = array<i32>} : memref<2x32xf32, #tpu.memory_space<vmem>>, vector<2x32xf32>,
    %c8_186 = arith.constant 8 : index
    %c0_187 = arith.constant 0 : index
    %353 = vector.load %arg5[%c8_186, %c0_187] : memref<16x64xf32, #tpu.memory_space<vmem>>, vector<2x32xf32>
    tpu.vector_store %arg5[%c8_186, %c0_187], %322 {strides = array<i32>} : memref<16x64xf32, #tpu.memory_space<vmem>>, vector<2x32xf32>,
    %c6_188 = arith.constant 6 : index
    %c32_189 = arith.constant 32 : index
    %354 = vector.load %arg5[%c6_188, %c32_189] : memref<16x64xf32, #tpu.memory_space<vmem>>, vector<2x32xf32>
    tpu.vector_store %arg5[%c6_188, %c32_189], %348 {strides = array<i32>} : memref<16x64xf32, #tpu.memory_space<vmem>>, vector<2x32xf32>,
    %c10_190 = arith.constant 10 : index
    %c0_191 = arith.constant 0 : index
    %355 = vector.load %arg6[%c10_190, %c0_191] : memref<16x256xf32, #tpu.memory_space<vmem>>, vector<2x128xf32>
    %c4_192 = arith.constant 4 : index
    %c128_193 = arith.constant 128 : index
    %356 = vector.load %arg6[%c4_192, %c128_193] : memref<16x256xf32, #tpu.memory_space<vmem>>, vector<2x128xf32>
    %c0_194 = arith.constant 0 : index
    %c0_195 = arith.constant 0 : index
    %357 = vector.load %arg7[%c0_194, %c0_195] : memref<2x32xf32, #tpu.memory_space<vmem>>, vector<2x32xf32>
    %c0_196 = arith.constant 0 : index
    %c0_197 = arith.constant 0 : index
    %358 = vector.load %arg2[%c0_196, %c0_197] : memref<32x128xf32, #tpu.memory_space<vmem>>, vector<32x128xf32>
    %cst_198 = arith.constant dense<0.000000e+00> : vector<2x128xf32>
    %359 = tpu.matmul %357, %358, %cst_198 {dimension_numbers = #tpu.dot_dimension_numbers<[1], [0], [0], [1], [0, 0, 1, 1], [], []>} : vector<2x32xf32>, vector<32x128xf32>, vector<2x128xf32> -> vector<2x128xf32>
    %360 = arith.addf %355, %359 : vector<2x128xf32>
    %c0_199 = arith.constant 0 : index
    %c0_200 = arith.constant 0 : index
    %361 = vector.load %arg9[%c0_199, %c0_200] : memref<2x32xf32, #tpu.memory_space<vmem>>, vector<2x32xf32>
    %c0_201 = arith.constant 0 : index
    %c0_202 = arith.constant 0 : index
    %362 = vector.load %arg3[%c0_201, %c0_202] : memref<32x128xf32, #tpu.memory_space<vmem>>, vector<32x128xf32>
    %cst_203 = arith.constant dense<0.000000e+00> : vector<2x128xf32>
    %363 = tpu.matmul %361, %362, %cst_203 {dimension_numbers = #tpu.dot_dimension_numbers<[1], [0], [0], [1], [0, 0, 1, 1], [], []>} : vector<2x32xf32>, vector<32x128xf32>, vector<2x128xf32> -> vector<2x128xf32>
    %364 = arith.addf %356, %363 : vector<2x128xf32>
    %c0_204 = arith.constant 0 : index
    %c0_205 = arith.constant 0 : index
    %365 = vector.load %arg8[%c0_204, %c0_205] : memref<2x32xf32, #tpu.memory_space<vmem>>, vector<2x32xf32>
    %366 = vector.extract_strided_slice %360 {offsets = [0, 0], sizes = [2, 32], strides = [1, 1]} : vector<2x128xf32> to vector<2x32xf32>
    %367 = arith.negf %366 : vector<2x32xf32>
    %368 = math.exp %367 : vector<2x32xf32>
    %cst_206 = arith.constant 1.000000e+00 : f32
    %369 = vector.broadcast %cst_206 : f32 to vector<2x32xf32>
    %370 = arith.addf %369, %368 : vector<2x32xf32>
    %371 = arith.divf %369, %370 : vector<2x32xf32>
    %372 = vector.extract_strided_slice %360 {offsets = [0, 32], sizes = [2, 32], strides = [1, 1]} : vector<2x128xf32> to vector<2x32xf32>
    %373 = arith.negf %372 : vector<2x32xf32>
    %374 = math.exp %373 : vector<2x32xf32>
    %cst_207 = arith.constant 1.000000e+00 : f32
    %375 = vector.broadcast %cst_207 : f32 to vector<2x32xf32>
    %376 = arith.addf %375, %374 : vector<2x32xf32>
    %377 = arith.divf %375, %376 : vector<2x32xf32>
    %378 = vector.extract_strided_slice %360 {offsets = [0, 64], sizes = [2, 32], strides = [1, 1]} : vector<2x128xf32> to vector<2x32xf32>
    %379 = math.tanh %378 : vector<2x32xf32>
    %380 = vector.extract_strided_slice %360 {offsets = [0, 96], sizes = [2, 32], strides = [1, 1]} : vector<2x128xf32> to vector<2x32xf32>
    %381 = arith.negf %380 : vector<2x32xf32>
    %382 = math.exp %381 : vector<2x32xf32>
    %cst_208 = arith.constant 1.000000e+00 : f32
    %383 = vector.broadcast %cst_208 : f32 to vector<2x32xf32>
    %384 = arith.addf %383, %382 : vector<2x32xf32>
    %385 = arith.divf %383, %384 : vector<2x32xf32>
    %386 = arith.mulf %377, %365 : vector<2x32xf32>
    %387 = arith.mulf %371, %379 : vector<2x32xf32>
    %388 = arith.addf %386, %387 : vector<2x32xf32>
    %389 = math.tanh %388 : vector<2x32xf32>
    %390 = arith.mulf %385, %389 : vector<2x32xf32>
    %c0_209 = arith.constant 0 : index
    %c0_210 = arith.constant 0 : index
    %391 = vector.load %arg10[%c0_209, %c0_210] : memref<2x32xf32, #tpu.memory_space<vmem>>, vector<2x32xf32>
    %392 = vector.extract_strided_slice %364 {offsets = [0, 0], sizes = [2, 32], strides = [1, 1]} : vector<2x128xf32> to vector<2x32xf32>
    %393 = arith.negf %392 : vector<2x32xf32>
    %394 = math.exp %393 : vector<2x32xf32>
    %cst_211 = arith.constant 1.000000e+00 : f32
    %395 = vector.broadcast %cst_211 : f32 to vector<2x32xf32>
    %396 = arith.addf %395, %394 : vector<2x32xf32>
    %397 = arith.divf %395, %396 : vector<2x32xf32>
    %398 = vector.extract_strided_slice %364 {offsets = [0, 32], sizes = [2, 32], strides = [1, 1]} : vector<2x128xf32> to vector<2x32xf32>
    %399 = arith.negf %398 : vector<2x32xf32>
    %400 = math.exp %399 : vector<2x32xf32>
    %cst_212 = arith.constant 1.000000e+00 : f32
    %401 = vector.broadcast %cst_212 : f32 to vector<2x32xf32>
    %402 = arith.addf %401, %400 : vector<2x32xf32>
    %403 = arith.divf %401, %402 : vector<2x32xf32>
    %404 = vector.extract_strided_slice %364 {offsets = [0, 64], sizes = [2, 32], strides = [1, 1]} : vector<2x128xf32> to vector<2x32xf32>
    %405 = math.tanh %404 : vector<2x32xf32>
    %406 = vector.extract_strided_slice %364 {offsets = [0, 96], sizes = [2, 32], strides = [1, 1]} : vector<2x128xf32> to vector<2x32xf32>
    %407 = arith.negf %406 : vector<2x32xf32>
    %408 = math.exp %407 : vector<2x32xf32>
    %cst_213 = arith.constant 1.000000e+00 : f32
    %409 = vector.broadcast %cst_213 : f32 to vector<2x32xf32>
    %410 = arith.addf %409, %408 : vector<2x32xf32>
    %411 = arith.divf %409, %410 : vector<2x32xf32>
    %412 = arith.mulf %403, %391 : vector<2x32xf32>
    %413 = arith.mulf %397, %405 : vector<2x32xf32>
    %414 = arith.addf %412, %413 : vector<2x32xf32>
    %415 = math.tanh %414 : vector<2x32xf32>
    %416 = arith.mulf %411, %415 : vector<2x32xf32>
    %c0_214 = arith.constant 0 : index
    %c0_215 = arith.constant 0 : index
    %417 = vector.load %arg7[%c0_214, %c0_215] : memref<2x32xf32, #tpu.memory_space<vmem>>, vector<2x32xf32>
    tpu.vector_store %arg7[%c0_214, %c0_215], %390 {strides = array<i32>} : memref<2x32xf32, #tpu.memory_space<vmem>>, vector<2x32xf32>,
    %c0_216 = arith.constant 0 : index
    %c0_217 = arith.constant 0 : index
    %418 = vector.load %arg8[%c0_216, %c0_217] : memref<2x32xf32, #tpu.memory_space<vmem>>, vector<2x32xf32>
    tpu.vector_store %arg8[%c0_216, %c0_217], %388 {strides = array<i32>} : memref<2x32xf32, #tpu.memory_space<vmem>>, vector<2x32xf32>,
    %c0_218 = arith.constant 0 : index
    %c0_219 = arith.constant 0 : index
    %419 = vector.load %arg9[%c0_218, %c0_219] : memref<2x32xf32, #tpu.memory_space<vmem>>, vector<2x32xf32>
    tpu.vector_store %arg9[%c0_218, %c0_219], %416 {strides = array<i32>} : memref<2x32xf32, #tpu.memory_space<vmem>>, vector<2x32xf32>,
    %c0_220 = arith.constant 0 : index
    %c0_221 = arith.constant 0 : index
    %420 = vector.load %arg10[%c0_220, %c0_221] : memref<2x32xf32, #tpu.memory_space<vmem>>, vector<2x32xf32>
    tpu.vector_store %arg10[%c0_220, %c0_221], %414 {strides = array<i32>} : memref<2x32xf32, #tpu.memory_space<vmem>>, vector<2x32xf32>,
    %c10_222 = arith.constant 10 : index
    %c0_223 = arith.constant 0 : index
    %421 = vector.load %arg5[%c10_222, %c0_223] : memref<16x64xf32, #tpu.memory_space<vmem>>, vector<2x32xf32>
    tpu.vector_store %arg5[%c10_222, %c0_223], %390 {strides = array<i32>} : memref<16x64xf32, #tpu.memory_space<vmem>>, vector<2x32xf32>,
    %c4_224 = arith.constant 4 : index
    %c32_225 = arith.constant 32 : index
    %422 = vector.load %arg5[%c4_224, %c32_225] : memref<16x64xf32, #tpu.memory_space<vmem>>, vector<2x32xf32>
    tpu.vector_store %arg5[%c4_224, %c32_225], %416 {strides = array<i32>} : memref<16x64xf32, #tpu.memory_space<vmem>>, vector<2x32xf32>,
    %c12_226 = arith.constant 12 : index
    %c0_227 = arith.constant 0 : index
    %423 = vector.load %arg6[%c12_226, %c0_227] : memref<16x256xf32, #tpu.memory_space<vmem>>, vector<2x128xf32>
    %c2_228 = arith.constant 2 : index
    %c128_229 = arith.constant 128 : index
    %424 = vector.load %arg6[%c2_228, %c128_229] : memref<16x256xf32, #tpu.memory_space<vmem>>, vector<2x128xf32>
    %c0_230 = arith.constant 0 : index
    %c0_231 = arith.constant 0 : index
    %425 = vector.load %arg7[%c0_230, %c0_231] : memref<2x32xf32, #tpu.memory_space<vmem>>, vector<2x32xf32>
    %c0_232 = arith.constant 0 : index
    %c0_233 = arith.constant 0 : index
    %426 = vector.load %arg2[%c0_232, %c0_233] : memref<32x128xf32, #tpu.memory_space<vmem>>, vector<32x128xf32>
    %cst_234 = arith.constant dense<0.000000e+00> : vector<2x128xf32>
    %427 = tpu.matmul %425, %426, %cst_234 {dimension_numbers = #tpu.dot_dimension_numbers<[1], [0], [0], [1], [0, 0, 1, 1], [], []>} : vector<2x32xf32>, vector<32x128xf32>, vector<2x128xf32> -> vector<2x128xf32>
    %428 = arith.addf %423, %427 : vector<2x128xf32>
    %c0_235 = arith.constant 0 : index
    %c0_236 = arith.constant 0 : index
    %429 = vector.load %arg9[%c0_235, %c0_236] : memref<2x32xf32, #tpu.memory_space<vmem>>, vector<2x32xf32>
    %c0_237 = arith.constant 0 : index
    %c0_238 = arith.constant 0 : index
    %430 = vector.load %arg3[%c0_237, %c0_238] : memref<32x128xf32, #tpu.memory_space<vmem>>, vector<32x128xf32>
    %cst_239 = arith.constant dense<0.000000e+00> : vector<2x128xf32>
    %431 = tpu.matmul %429, %430, %cst_239 {dimension_numbers = #tpu.dot_dimension_numbers<[1], [0], [0], [1], [0, 0, 1, 1], [], []>} : vector<2x32xf32>, vector<32x128xf32>, vector<2x128xf32> -> vector<2x128xf32>
    %432 = arith.addf %424, %431 : vector<2x128xf32>
    %c0_240 = arith.constant 0 : index
    %c0_241 = arith.constant 0 : index
    %433 = vector.load %arg8[%c0_240, %c0_241] : memref<2x32xf32, #tpu.memory_space<vmem>>, vector<2x32xf32>
    %434 = vector.extract_strided_slice %428 {offsets = [0, 0], sizes = [2, 32], strides = [1, 1]} : vector<2x128xf32> to vector<2x32xf32>
    %435 = arith.negf %434 : vector<2x32xf32>
    %436 = math.exp %435 : vector<2x32xf32>
    %cst_242 = arith.constant 1.000000e+00 : f32
    %437 = vector.broadcast %cst_242 : f32 to vector<2x32xf32>
    %438 = arith.addf %437, %436 : vector<2x32xf32>
    %439 = arith.divf %437, %438 : vector<2x32xf32>
    %440 = vector.extract_strided_slice %428 {offsets = [0, 32], sizes = [2, 32], strides = [1, 1]} : vector<2x128xf32> to vector<2x32xf32>
    %441 = arith.negf %440 : vector<2x32xf32>
    %442 = math.exp %441 : vector<2x32xf32>
    %cst_243 = arith.constant 1.000000e+00 : f32
    %443 = vector.broadcast %cst_243 : f32 to vector<2x32xf32>
    %444 = arith.addf %443, %442 : vector<2x32xf32>
    %445 = arith.divf %443, %444 : vector<2x32xf32>
    %446 = vector.extract_strided_slice %428 {offsets = [0, 64], sizes = [2, 32], strides = [1, 1]} : vector<2x128xf32> to vector<2x32xf32>
    %447 = math.tanh %446 : vector<2x32xf32>
    %448 = vector.extract_strided_slice %428 {offsets = [0, 96], sizes = [2, 32], strides = [1, 1]} : vector<2x128xf32> to vector<2x32xf32>
    %449 = arith.negf %448 : vector<2x32xf32>
    %450 = math.exp %449 : vector<2x32xf32>
    %cst_244 = arith.constant 1.000000e+00 : f32
    %451 = vector.broadcast %cst_244 : f32 to vector<2x32xf32>
    %452 = arith.addf %451, %450 : vector<2x32xf32>
    %453 = arith.divf %451, %452 : vector<2x32xf32>
    %454 = arith.mulf %445, %433 : vector<2x32xf32>
    %455 = arith.mulf %439, %447 : vector<2x32xf32>
    %456 = arith.addf %454, %455 : vector<2x32xf32>
    %457 = math.tanh %456 : vector<2x32xf32>
    %458 = arith.mulf %453, %457 : vector<2x32xf32>
    %c0_245 = arith.constant 0 : index
    %c0_246 = arith.constant 0 : index
    %459 = vector.load %arg10[%c0_245, %c0_246] : memref<2x32xf32, #tpu.memory_space<vmem>>, vector<2x32xf32>
    %460 = vector.extract_strided_slice %432 {offsets = [0, 0], sizes = [2, 32], strides = [1, 1]} : vector<2x128xf32> to vector<2x32xf32>
    %461 = arith.negf %460 : vector<2x32xf32>
    %462 = math.exp %461 : vector<2x32xf32>
    %cst_247 = arith.constant 1.000000e+00 : f32
    %463 = vector.broadcast %cst_247 : f32 to vector<2x32xf32>
    %464 = arith.addf %463, %462 : vector<2x32xf32>
    %465 = arith.divf %463, %464 : vector<2x32xf32>
    %466 = vector.extract_strided_slice %432 {offsets = [0, 32], sizes = [2, 32], strides = [1, 1]} : vector<2x128xf32> to vector<2x32xf32>
    %467 = arith.negf %466 : vector<2x32xf32>
    %468 = math.exp %467 : vector<2x32xf32>
    %cst_248 = arith.constant 1.000000e+00 : f32
    %469 = vector.broadcast %cst_248 : f32 to vector<2x32xf32>
    %470 = arith.addf %469, %468 : vector<2x32xf32>
    %471 = arith.divf %469, %470 : vector<2x32xf32>
    %472 = vector.extract_strided_slice %432 {offsets = [0, 64], sizes = [2, 32], strides = [1, 1]} : vector<2x128xf32> to vector<2x32xf32>
    %473 = math.tanh %472 : vector<2x32xf32>
    %474 = vector.extract_strided_slice %432 {offsets = [0, 96], sizes = [2, 32], strides = [1, 1]} : vector<2x128xf32> to vector<2x32xf32>
    %475 = arith.negf %474 : vector<2x32xf32>
    %476 = math.exp %475 : vector<2x32xf32>
    %cst_249 = arith.constant 1.000000e+00 : f32
    %477 = vector.broadcast %cst_249 : f32 to vector<2x32xf32>
    %478 = arith.addf %477, %476 : vector<2x32xf32>
    %479 = arith.divf %477, %478 : vector<2x32xf32>
    %480 = arith.mulf %471, %459 : vector<2x32xf32>
    %481 = arith.mulf %465, %473 : vector<2x32xf32>
    %482 = arith.addf %480, %481 : vector<2x32xf32>
    %483 = math.tanh %482 : vector<2x32xf32>
    %484 = arith.mulf %479, %483 : vector<2x32xf32>
    %c0_250 = arith.constant 0 : index
    %c0_251 = arith.constant 0 : index
    %485 = vector.load %arg7[%c0_250, %c0_251] : memref<2x32xf32, #tpu.memory_space<vmem>>, vector<2x32xf32>
    tpu.vector_store %arg7[%c0_250, %c0_251], %458 {strides = array<i32>} : memref<2x32xf32, #tpu.memory_space<vmem>>, vector<2x32xf32>,
    %c0_252 = arith.constant 0 : index
    %c0_253 = arith.constant 0 : index
    %486 = vector.load %arg8[%c0_252, %c0_253] : memref<2x32xf32, #tpu.memory_space<vmem>>, vector<2x32xf32>
    tpu.vector_store %arg8[%c0_252, %c0_253], %456 {strides = array<i32>} : memref<2x32xf32, #tpu.memory_space<vmem>>, vector<2x32xf32>,
    %c0_254 = arith.constant 0 : index
    %c0_255 = arith.constant 0 : index
    %487 = vector.load %arg9[%c0_254, %c0_255] : memref<2x32xf32, #tpu.memory_space<vmem>>, vector<2x32xf32>
    tpu.vector_store %arg9[%c0_254, %c0_255], %484 {strides = array<i32>} : memref<2x32xf32, #tpu.memory_space<vmem>>, vector<2x32xf32>,
    %c0_256 = arith.constant 0 : index
    %c0_257 = arith.constant 0 : index
    %488 = vector.load %arg10[%c0_256, %c0_257] : memref<2x32xf32, #tpu.memory_space<vmem>>, vector<2x32xf32>
    tpu.vector_store %arg10[%c0_256, %c0_257], %482 {strides = array<i32>} : memref<2x32xf32, #tpu.memory_space<vmem>>, vector<2x32xf32>,
    %c12_258 = arith.constant 12 : index
    %c0_259 = arith.constant 0 : index
    %489 = vector.load %arg5[%c12_258, %c0_259] : memref<16x64xf32, #tpu.memory_space<vmem>>, vector<2x32xf32>
    tpu.vector_store %arg5[%c12_258, %c0_259], %458 {strides = array<i32>} : memref<16x64xf32, #tpu.memory_space<vmem>>, vector<2x32xf32>,
    %c2_260 = arith.constant 2 : index
    %c32_261 = arith.constant 32 : index
    %490 = vector.load %arg5[%c2_260, %c32_261] : memref<16x64xf32, #tpu.memory_space<vmem>>, vector<2x32xf32>
    tpu.vector_store %arg5[%c2_260, %c32_261], %484 {strides = array<i32>} : memref<16x64xf32, #tpu.memory_space<vmem>>, vector<2x32xf32>,
    %c14_262 = arith.constant 14 : index
    %c0_263 = arith.constant 0 : index
    %491 = vector.load %arg6[%c14_262, %c0_263] : memref<16x256xf32, #tpu.memory_space<vmem>>, vector<2x128xf32>
    %c0_264 = arith.constant 0 : index
    %c128_265 = arith.constant 128 : index
    %492 = vector.load %arg6[%c0_264, %c128_265] : memref<16x256xf32, #tpu.memory_space<vmem>>, vector<2x128xf32>
    %c0_266 = arith.constant 0 : index
    %c0_267 = arith.constant 0 : index
    %493 = vector.load %arg7[%c0_266, %c0_267] : memref<2x32xf32, #tpu.memory_space<vmem>>, vector<2x32xf32>
    %c0_268 = arith.constant 0 : index
    %c0_269 = arith.constant 0 : index
    %494 = vector.load %arg2[%c0_268, %c0_269] : memref<32x128xf32, #tpu.memory_space<vmem>>, vector<32x128xf32>
    %cst_270 = arith.constant dense<0.000000e+00> : vector<2x128xf32>
    %495 = tpu.matmul %493, %494, %cst_270 {dimension_numbers = #tpu.dot_dimension_numbers<[1], [0], [0], [1], [0, 0, 1, 1], [], []>} : vector<2x32xf32>, vector<32x128xf32>, vector<2x128xf32> -> vector<2x128xf32>
    %496 = arith.addf %491, %495 : vector<2x128xf32>
    %c0_271 = arith.constant 0 : index
    %c0_272 = arith.constant 0 : index
    %497 = vector.load %arg9[%c0_271, %c0_272] : memref<2x32xf32, #tpu.memory_space<vmem>>, vector<2x32xf32>
    %c0_273 = arith.constant 0 : index
    %c0_274 = arith.constant 0 : index
    %498 = vector.load %arg3[%c0_273, %c0_274] : memref<32x128xf32, #tpu.memory_space<vmem>>, vector<32x128xf32>
    %cst_275 = arith.constant dense<0.000000e+00> : vector<2x128xf32>
    %499 = tpu.matmul %497, %498, %cst_275 {dimension_numbers = #tpu.dot_dimension_numbers<[1], [0], [0], [1], [0, 0, 1, 1], [], []>} : vector<2x32xf32>, vector<32x128xf32>, vector<2x128xf32> -> vector<2x128xf32>
    %500 = arith.addf %492, %499 : vector<2x128xf32>
    %c0_276 = arith.constant 0 : index
    %c0_277 = arith.constant 0 : index
    %501 = vector.load %arg8[%c0_276, %c0_277] : memref<2x32xf32, #tpu.memory_space<vmem>>, vector<2x32xf32>
    %502 = vector.extract_strided_slice %496 {offsets = [0, 0], sizes = [2, 32], strides = [1, 1]} : vector<2x128xf32> to vector<2x32xf32>
    %503 = arith.negf %502 : vector<2x32xf32>
    %504 = math.exp %503 : vector<2x32xf32>
    %cst_278 = arith.constant 1.000000e+00 : f32
    %505 = vector.broadcast %cst_278 : f32 to vector<2x32xf32>
    %506 = arith.addf %505, %504 : vector<2x32xf32>
    %507 = arith.divf %505, %506 : vector<2x32xf32>
    %508 = vector.extract_strided_slice %496 {offsets = [0, 32], sizes = [2, 32], strides = [1, 1]} : vector<2x128xf32> to vector<2x32xf32>
    %509 = arith.negf %508 : vector<2x32xf32>
    %510 = math.exp %509 : vector<2x32xf32>
    %cst_279 = arith.constant 1.000000e+00 : f32
    %511 = vector.broadcast %cst_279 : f32 to vector<2x32xf32>
    %512 = arith.addf %511, %510 : vector<2x32xf32>
    %513 = arith.divf %511, %512 : vector<2x32xf32>
    %514 = vector.extract_strided_slice %496 {offsets = [0, 64], sizes = [2, 32], strides = [1, 1]} : vector<2x128xf32> to vector<2x32xf32>
    %515 = math.tanh %514 : vector<2x32xf32>
    %516 = vector.extract_strided_slice %496 {offsets = [0, 96], sizes = [2, 32], strides = [1, 1]} : vector<2x128xf32> to vector<2x32xf32>
    %517 = arith.negf %516 : vector<2x32xf32>
    %518 = math.exp %517 : vector<2x32xf32>
    %cst_280 = arith.constant 1.000000e+00 : f32
    %519 = vector.broadcast %cst_280 : f32 to vector<2x32xf32>
    %520 = arith.addf %519, %518 : vector<2x32xf32>
    %521 = arith.divf %519, %520 : vector<2x32xf32>
    %522 = arith.mulf %513, %501 : vector<2x32xf32>
    %523 = arith.mulf %507, %515 : vector<2x32xf32>
    %524 = arith.addf %522, %523 : vector<2x32xf32>
    %525 = math.tanh %524 : vector<2x32xf32>
    %526 = arith.mulf %521, %525 : vector<2x32xf32>
    %c0_281 = arith.constant 0 : index
    %c0_282 = arith.constant 0 : index
    %527 = vector.load %arg10[%c0_281, %c0_282] : memref<2x32xf32, #tpu.memory_space<vmem>>, vector<2x32xf32>
    %528 = vector.extract_strided_slice %500 {offsets = [0, 0], sizes = [2, 32], strides = [1, 1]} : vector<2x128xf32> to vector<2x32xf32>
    %529 = arith.negf %528 : vector<2x32xf32>
    %530 = math.exp %529 : vector<2x32xf32>
    %cst_283 = arith.constant 1.000000e+00 : f32
    %531 = vector.broadcast %cst_283 : f32 to vector<2x32xf32>
    %532 = arith.addf %531, %530 : vector<2x32xf32>
    %533 = arith.divf %531, %532 : vector<2x32xf32>
    %534 = vector.extract_strided_slice %500 {offsets = [0, 32], sizes = [2, 32], strides = [1, 1]} : vector<2x128xf32> to vector<2x32xf32>
    %535 = arith.negf %534 : vector<2x32xf32>
    %536 = math.exp %535 : vector<2x32xf32>
    %cst_284 = arith.constant 1.000000e+00 : f32
    %537 = vector.broadcast %cst_284 : f32 to vector<2x32xf32>
    %538 = arith.addf %537, %536 : vector<2x32xf32>
    %539 = arith.divf %537, %538 : vector<2x32xf32>
    %540 = vector.extract_strided_slice %500 {offsets = [0, 64], sizes = [2, 32], strides = [1, 1]} : vector<2x128xf32> to vector<2x32xf32>
    %541 = math.tanh %540 : vector<2x32xf32>
    %542 = vector.extract_strided_slice %500 {offsets = [0, 96], sizes = [2, 32], strides = [1, 1]} : vector<2x128xf32> to vector<2x32xf32>
    %543 = arith.negf %542 : vector<2x32xf32>
    %544 = math.exp %543 : vector<2x32xf32>
    %cst_285 = arith.constant 1.000000e+00 : f32
    %545 = vector.broadcast %cst_285 : f32 to vector<2x32xf32>
    %546 = arith.addf %545, %544 : vector<2x32xf32>
    %547 = arith.divf %545, %546 : vector<2x32xf32>
    %548 = arith.mulf %539, %527 : vector<2x32xf32>
    %549 = arith.mulf %533, %541 : vector<2x32xf32>
    %550 = arith.addf %548, %549 : vector<2x32xf32>
    %551 = math.tanh %550 : vector<2x32xf32>
    %552 = arith.mulf %547, %551 : vector<2x32xf32>
    %c0_286 = arith.constant 0 : index
    %c0_287 = arith.constant 0 : index
    %553 = vector.load %arg7[%c0_286, %c0_287] : memref<2x32xf32, #tpu.memory_space<vmem>>, vector<2x32xf32>
    tpu.vector_store %arg7[%c0_286, %c0_287], %526 {strides = array<i32>} : memref<2x32xf32, #tpu.memory_space<vmem>>, vector<2x32xf32>,
    %c0_288 = arith.constant 0 : index
    %c0_289 = arith.constant 0 : index
    %554 = vector.load %arg8[%c0_288, %c0_289] : memref<2x32xf32, #tpu.memory_space<vmem>>, vector<2x32xf32>
    tpu.vector_store %arg8[%c0_288, %c0_289], %524 {strides = array<i32>} : memref<2x32xf32, #tpu.memory_space<vmem>>, vector<2x32xf32>,
    %c0_290 = arith.constant 0 : index
    %c0_291 = arith.constant 0 : index
    %555 = vector.load %arg9[%c0_290, %c0_291] : memref<2x32xf32, #tpu.memory_space<vmem>>, vector<2x32xf32>
    tpu.vector_store %arg9[%c0_290, %c0_291], %552 {strides = array<i32>} : memref<2x32xf32, #tpu.memory_space<vmem>>, vector<2x32xf32>,
    %c0_292 = arith.constant 0 : index
    %c0_293 = arith.constant 0 : index
    %556 = vector.load %arg10[%c0_292, %c0_293] : memref<2x32xf32, #tpu.memory_space<vmem>>, vector<2x32xf32>
    tpu.vector_store %arg10[%c0_292, %c0_293], %550 {strides = array<i32>} : memref<2x32xf32, #tpu.memory_space<vmem>>, vector<2x32xf32>,
    %c14_294 = arith.constant 14 : index
    %c0_295 = arith.constant 0 : index
    %557 = vector.load %arg5[%c14_294, %c0_295] : memref<16x64xf32, #tpu.memory_space<vmem>>, vector<2x32xf32>
    tpu.vector_store %arg5[%c14_294, %c0_295], %526 {strides = array<i32>} : memref<16x64xf32, #tpu.memory_space<vmem>>, vector<2x32xf32>,
    %c0_296 = arith.constant 0 : index
    %c32_297 = arith.constant 32 : index
    %558 = vector.load %arg5[%c0_296, %c32_297] : memref<16x64xf32, #tpu.memory_space<vmem>>, vector<2x32xf32>
    tpu.vector_store %arg5[%c0_296, %c32_297], %552 {strides = array<i32>} : memref<16x64xf32, #tpu.memory_space<vmem>>, vector<2x32xf32>,
    return
  }
}

</mosaic_0001>

<bundles_post_ra>
// kernel: tpu_custom_call.1
= control target key start
LH: loop header
LB: loop body
LE: loop exit
PB: predicated region body
PF: predicated region fallthrough
CT: control target
= control target key end

     0   :  { %10 = vsyncpa [#allocation8], 0  ;;  %s3203_s0 = inlined_call_operand.hbm [shape: f32[16,32], index: 0, kind: input, shape index: {}]   ;;  %s3204_s1 = inlined_call_operand.hbm [shape: f32[32,256], index: 1, kind: input, shape index: {}]   ;;  %s3205_s2 = inlined_call_operand.hbm [shape: f32[32,128], index: 2, kind: input, shape index: {}]   ;;  %s3206_s3 = inlined_call_operand.hbm [shape: f32[32,128], index: 3, kind: input, shape index: {}]   ;;  %s3207_s4 = inlined_call_operand.vmem [shape: f32[1,256], index: 4, kind: input, shape index: {}]   ;;  %s3208_s5 = inlined_call_operand.hbm [shape: f32[16,64], index: 5, kind: output, shape index: {}]  }
   0x1   :  { %11 = vsyncpa [#allocation11], 0 }
   0x2   :  { %12 = vsyncpa [#allocation14], 0 }
   0x3   :  { %13 = vsyncpa [#allocation9], 0  ;;  %s2749_s18 = smov [#allocation10]  }
   0x4   :  { %s31_s19 = sshll.u32 %s2749_s18, 4  ;;  %s32_s19 = int_to_ptr.vmem [resolvable:$true] %s31_s19 }
   0x5   :  { %s2649_s20 = scalar_lea.vmem %s32_s19, 1024  ;;  %p2654_p1 = scmp.lt.s32.totalorder %s32_s19, %s32_s19 }
   0x6   :  { %p2650_p0 = scmp.ne.s32.totalorder %s32_s19, %s2649_s20  ;;  %p2655_p2 = scmp.lt.s32.totalorder %s2649_s20, %s2649_s20 }
   0x8   :  { %p2656_p3 = por %p2655_p2, %p2654_p1 }
   0xa   :  { %p2657_p4 = pnand %p2656_p3, %p2650_p0 }
   0xc   :  { %2660 = shalt.err (!%p2657_p4)
}
   0xd   :  { %s2750_s21 = smov 256   ;;  %s2751_s22 = smov 16  }
   0xe   :  { %37 = dma.hbm_to_vmem [thread:$0]  %s3204_s1, 1024, %s32_s19, [#allocation11], %s2750_s21, %s2750_s21, %s2751_s22  }
   0xf   :  { %s2752_s25 = smov [#allocation7]  }
  0x10   :  { %s19_s26 = sshll.u32 %s2752_s25, 4  ;;  %s20_s26 = int_to_ptr.vmem [resolvable:$true] %s19_s26 }
  0x11   :  { %s2669_s27 = scalar_lea.vmem %s20_s26, 256  ;;  %p2674_p6 = scmp.lt.s32.totalorder %s20_s26, %s20_s26 }
  0x12   :  { %p2670_p5 = scmp.ne.s32.totalorder %s20_s26, %s2669_s27  ;;  %p2675_p7 = scmp.lt.s32.totalorder %s2669_s27, %s2669_s27 }
  0x14   :  { %p2676_p8 = por %p2675_p7, %p2674_p6 }
  0x16   :  { %p2677_p9 = pnand %p2676_p8, %p2670_p5 }
  0x18   :  { %2680 = shalt.err (!%p2677_p9)
}
  0x19   :  { %s2753_s28 = smov 128   ;;  %s2754_s29 = smov 8  }
  0x1a   :  { %25 = dma.hbm_to_vmem [thread:$0]  %s3203_s0, 256, %s20_s26, [#allocation8], %s2753_s28, %s2753_s28, %s2754_s29  }
  0x1b   :  { %s2755_s1 = smov [#allocation12]   ;;  %s2756_s8 = smov [#allocation13]  }
  0x1c   :  { %s43_s7 = sshll.u32 %s2755_s1, 4  ;;  %s55_s9 = sshll.u32 %s2756_s8, 4  ;;  %s44_s7 = int_to_ptr.vmem [resolvable:$true] %s43_s7  ;;  %s56_s9 = int_to_ptr.vmem [resolvable:$true] %s55_s9 }
  0x1d   :  { %s2689_s10 = scalar_lea.vmem %s44_s7, 512  ;;  %p2694_p11 = scmp.lt.s32.totalorder %s44_s7, %s44_s7 }
  0x1e   :  { %p2690_p10 = scmp.ne.s32.totalorder %s44_s7, %s2689_s10  ;;  %p2695_p12 = scmp.lt.s32.totalorder %s2689_s10, %s2689_s10 }
  0x20   :  { %p2696_p13 = por %p2695_p12, %p2694_p11 }
  0x22   :  { %p2697_p0 = pnand %p2696_p13, %p2690_p10 }
  0x24   :  { %2700 = shalt.err (!%p2697_p0)
}
  0x25   :  { %49 = dma.hbm_to_vmem [thread:$0]  %s3205_s2, 512, %s44_s7, [#allocation11], %s2753_s28, %s2753_s28, %s2754_s29  }
  0x26   :  { %s2709_s0 = scalar_lea.vmem %s56_s9, 512  ;;  %p2714_p2 = scmp.lt.s32.totalorder %s56_s9, %s56_s9 }
  0x27   :  { %p2710_p1 = scmp.ne.s32.totalorder %s56_s9, %s2709_s0  ;;  %p2715_p3 = scmp.lt.s32.totalorder %s2709_s0, %s2709_s0 }
  0x29   :  { %p2716_p4 = por %p2715_p3, %p2714_p2 }
  0x2b   :  { %p2717_p5 = pnand %p2716_p4, %p2710_p1 }
  0x2d   :  { %2720 = shalt.err (!%p2717_p5)
}
  0x2e   :  { %61 = dma.hbm_to_vmem [thread:$0]  %s3206_s3, 512, %s56_s9, [#allocation14], %s2753_s28, %s2753_s28, %s2754_s29  }
  0x2f   :  { %2741 = dma.done.wait [#allocation8], 256  }
  0x30   :  { %2742 = vsyncadd [#allocation8], 4294967040 }
  0x31   :  { %2743 = dma.done.wait [#allocation11], 1536  }
  0x32   :  { %2744 = vsyncadd [#allocation11], 4294965760 }
  0x33   :  { %2745 = dma.done.wait [#allocation14], 512  }
  0x34   :  { %2746 = vsyncadd [#allocation14], 4294966784  ;;  %vm186_vm0 = vcmask 254976   ;;  %v2757_v0 = vmov 0.0   ;;  %vm2758_vm1 = vmmov 0   ;;  %v85_v1 = vld [vmem:[#allocation10 + $0x38] sm:$0xff]  ;;  %v88_v22 = vlaneseq }
  0x35   :  { %169 = vmatprep.mubr.f32.mxu0 %v2757_v0  ;;  %2323 = vmatprep.subr.mxu1 %v2757_v0  ;;  %187 = vst.msk [vmem:[#allocation3] sm:$0x3] %vm186_vm0, %v2757_v0  ;;  %188 = vst.msk [vmem:[#allocation4] sm:$0x3] %vm186_vm0, %v2757_v0  ;;  %v84_v2 = vld [vmem:[#allocation10 + $0x30] sm:$0xff]  ;;  %v83_v3 = vld [vmem:[#allocation10 + $0x28] sm:$0xff] }
  0x36   :  { %189 = vst.msk [vmem:[#allocation5] sm:$0x3] %vm186_vm0, %v2757_v0  ;;  %190 = vst.msk [vmem:[#allocation6] sm:$0x3] %vm186_vm0, %v2757_v0  ;;  %2331 = vmatprep.mubr.msk.f32.mxu1 %vm2758_vm1, %v2757_v0  ;;  %129 = vmatprep.subr.mxu0 %v85_v1  ;;  %v82_v4 = vld [vmem:[#allocation10 + $0x20] sm:$0xff]  ;;  %v81_v5 = vld [vmem:[#allocation10 + $0x18] sm:$0xff] }
  0x37   :  { %130 = vmatpush1.msra.mxu0 %v84_v2  ;;  %v80_v6 = vld [vmem:[#allocation10 + $0x10] sm:$0xff]  ;;  %v2826_v7 = vld [vmem:[#allocation12 + $0x18] sm:$0xff]  ;;  %v79_v9 = vld [vmem:[#allocation10 + $0x8] sm:$0xff]  ;;  %vm98_vm2 = vcmask 261120   ;;  %s2759_s2 = smov 32   ;;  %v89_v23 = vshrl.u32 %v88_v22, 7 }
  0x38   :  { %131 = vmatprep.subr.mxu0 %v83_v3  ;;  %v2828_v8 = vld [vmem:[#allocation12 + $0x10] sm:$0xff]  ;;  %2324 = vmatpush3.msra.mxu1 %v2826_v7  ;;  %v78_v10 = vld [vmem:[#allocation10] sm:$0xff]  ;;  %v2832_v11 = vld [vmem:[#allocation12 + $0x8] sm:$0xff]  ;;  %s2761_s16 = smov 96   ;;  %vm427_vm3 = vcmask 261126   ;;  %vm670_vm4 = vcmask 257026  }
  0x39   :  { %132 = vmatpush1.msra.mxu0 %v82_v4  ;;  %2325 = vmatprep.subr.mxu1 %v2757_v0  ;;  %v76_v12 = vld [vmem:[#allocation7] sm:$0xff]  ;;  %v2835_v13 = vld [vmem:[#allocation13 + $0x18] sm:$0xff]  ;;  %v2843_v15 = vld [vmem:[#allocation12] sm:$0xff]  ;;  %v90_v24 = vsub.s32 0, %v89_v23  ;;  %v94_v26 = vsub.s32 1, %v89_v23  ;;  %vm681_vm5 = vcmask 259076  }
  0x3a   :  { %133 = vmatprep.subr.mxu0 %v81_v5  ;;  %2326 = vmatpush3.msra.mxu1 %v2828_v8  ;;  %v2841_v14 = vld [vmem:[#allocation13 + $0x10] sm:$0xff]  ;;  %v77_v16 = vld [vmem:[#allocation7 + $0x8] sm:$0xff]  ;;  %v2849_v17 = vld [vmem:[#allocation13 + $0x8] sm:$0xff]  ;;  %vm438_vm6 = vcmask 523526   ;;  %vm692_vm7 = vcmask 521476   ;;  %vm944_vm8 = vcmask 519426  }
  0x3b   :  { %134 = vmatpush1.msra.mxu0 %v80_v6  ;;  %2327 = vmatprep.subr.mxu1 %v2757_v0  ;;  %v2855_v19 = vld [vmem:[#allocation13] sm:$0xff]  ;;  %v86_v25 = vld [vmem:[%s3207_s4] sm:$0x3]  ;;  %s2760_s4 = smov 64   ;;  %vm1192_vm9 = vcmask 517376   ;;  %s2762_s17 = smov [#allocation15]  }
  0x3c   :  { %135 = vmatprep.subr.mxu0 %v79_v9  ;;  %2328 = vmatpush3.msra.mxu1 %v2832_v11  ;;  %v193_v18 = vld [vmem:[#allocation3] sm:$0x3]  ;;  %v354_v20 = vld [vmem:[#allocation4] sm:$0x3]  ;;  %v91_v27 = vrot.slane %v86_v25, %v90_v24  ;;  %v95_v28 = vrot.slane %v86_v25, %v94_v26  ;;  %s2195_s18 = sshll.u32 %s2762_s17, 4  ;;  %s2196_s18 = int_to_ptr.vmem [resolvable:$true] %s2195_s18 }
  0x3d   :  { %136 = vmatpush1.msra.mxu0 %v78_v10  ;;  %2329 = vmatprep.subr.mxu1 %v2757_v0  ;;  %v272_v21 = vld [vmem:[#allocation5] sm:$0x3]  ;;  %v383_v47 = vld [vmem:[#allocation6] sm:$0x3]  ;;  %s2721_s19 = scalar_lea.vmem %s2196_s18, 256  ;;  %p2726_p7 = scmp.lt.s32.totalorder %s2196_s18, %s2196_s18 }
  0x3e   :  { %2209 = vmatmul.mubr.msk.f32.vlgmr.msra.gmra.mxu0 %vm98_vm2, %v76_v12  ;;  %2334 = vmatprep.subr.mxu0 %v2757_v0  ;;  %v392_v49 = vrot.slane %v383_v47, 2  ;;  %p2722_p6 = scmp.ne.s32.totalorder %s2196_s18, %s2721_s19  ;;  %p2727_p8 = scmp.lt.s32.totalorder %s2721_s19, %s2721_s19 }
  0x3f   :  { %175 = vmatprep.mubr.f32.mxu0 %v2757_v0  ;;  %2335 = vmatpush3.msra.mxu0 %v2835_v13 }
  0x40   :  { %2336 = vmatprep.subr.mxu0 %v2757_v0  ;;  %2330 = vmatpush3.msra.mxu1 %v2843_v15  ;;  %p2728_p9 = por %p2727_p8, %p2726_p7 }
  0x41   :  { %2337 = vmatpush3.msra.mxu0 %v2841_v14  ;;  %2332 = vmatmul.mubr.msk.f32.vlgmr.msra.gmra.mxu1 %vm98_vm2, %v193_v18 }
  0x42   :  { %2210 = vmatmul.mubr.msk.f32.gmra.mxu0 %vm98_vm2, %v77_v16  ;;  %2338 = vmatprep.subr.mxu0 %v2757_v0  ;;  %p2729_p10 = pnand %p2728_p9, %p2722_p6 }
  0x43   :  { %2339 = vmatpush3.msra.mxu0 %v2849_v17  ;;  %2342 = vmatprep.mubr.msk.f32.mxu0 %vm2758_vm1, %v2757_v0 }
  0x44   :  { %2340 = vmatprep.subr.mxu0 %v2757_v0  ;;  %363 = vrot.lane.b32.xlu1 %v354_v20, %s2759_s2 }
  0x45   :  { %2341 = vmatpush3.msra.mxu0 %v2855_v19  ;;  %2345 = vmatprep.subr.mxu1 %v2757_v0 }
  0x46   :  { %2343 = vmatmul.mubr.msk.f32.vlgmr.msra.gmra.mxu0 %vm98_vm2, %v272_v21  ;;  %2346 = vmatpush3.msra.mxu1 %v2826_v7 }
  0x47   :  { %2356 = vmatprep.subr.mxu0 %v2757_v0  ;;  %2347 = vmatprep.subr.mxu1 %v2757_v0 }
  0x48   :  { %2353 = vmatprep.mubr.msk.f32.mxu1 %vm2758_vm1, %v2757_v0  ;;  %2348 = vmatpush3.msra.mxu1 %v2828_v8 }
  0x49   :  { %2357 = vmatpush3.msra.mxu0 %v2835_v13  ;;  %2349 = vmatprep.subr.mxu1 %v2757_v0 }
  0x4a   :  { %2358 = vmatprep.subr.mxu0 %v2757_v0  ;;  %2350 = vmatpush3.msra.mxu1 %v2832_v11 }
  0x4b   :  { %2359 = vmatpush3.msra.mxu0 %v2841_v14  ;;  %2351 = vmatprep.subr.mxu1 %v2757_v0 }
  0x4c   :  { %2360 = vmatprep.subr.mxu0 %v2757_v0  ;;  %2352 = vmatpush3.msra.mxu1 %v2843_v15 }
  0x4d   :  { %2361 = vmatpush3.msra.mxu0 %v2849_v17  ;;  %2364 = vmatprep.mubr.msk.f32.mxu0 %vm2758_vm1, %v2757_v0 }
  0x4e   :  { %2362 = vmatprep.subr.mxu0 %v2757_v0  ;;  %2367 = vmatprep.subr.mxu1 %v2757_v0 }
  0x4f   :  { %2363 = vmatpush3.msra.mxu0 %v2855_v19 }
  0x50   :  { %2378 = vmatprep.subr.mxu0 %v2757_v0 }
  0xb6   :  { %v364_v62 = vpop.permute.xlu1 %363 }
  0xfe   :  { %v171_v29 = vpop.f32.mrf.mxu0 }
  0xff   :  { %v172_v30 = vadd.f32 %v171_v29, %v91_v27 }
 0x100   :  { %v173_v31 = vpop.f32.mrf.mxu0 }
 0x101   :  { %182 = vst [vmem:[#allocation2 + $0x10] sm:$0xff] %v172_v30  ;;  %v174_v32 = vadd.f32 %v173_v31, %v95_v28  ;;  %v267_v35 = vpop.f32.mrf.mxu1 }
 0x102   :  { %v177_v33 = vpop.f32.mrf.mxu0 }
 0x103   :  { %183 = vst [vmem:[#allocation2] sm:$0xff] %v174_v32  ;;  %v178_v34 = vadd.f32 %v177_v33, %v91_v27  ;;  %v2333_v38 = vpop.f32.mrf.mxu1 }
 0x104   :  { %v179_v36 = vpop.f32.mrf.mxu0 }
 0x105   :  { %184 = vst [vmem:[#allocation2 + $0x18] sm:$0xff] %v178_v34  ;;  %v180_v37 = vadd.f32 %v179_v36, %v95_v28 }
 0x106   :  { %v346_v39 = vpop.f32.mrf.mxu0 }
 0x107   :  { %185 = vst [vmem:[#allocation2 + $0x8] sm:$0xff] %v180_v37  ;;  %v351_v43 = vrot.slane %v346_v39, 2 }
 0x108   :  { %v191_v40 = vld [vmem:[#allocation2 + $0x10] sm:$0x3]  ;;  %v2344_v41 = vpop.f32.mrf.mxu0  ;;  %v440_v29 = vld [vmem:[#allocation2 + $0x10] sm:$0xc] }
 0x109   :  { %v271_v42 = vadd.f32 %v267_v35, %v191_v40 }
 0x10b   :  { %2513 = vtanh.f32 %v271_v42  ;;  %v2213_v50 = vmul.f32 -1.442695, %v271_v42 }
 0x10e   :  { %v192_v44 = vld [vmem:[#allocation2 + $0x8] sm:$0xc0]  ;;  %v441_v34 = vld [vmem:[#allocation2 + $0x8] sm:$0x30] }
 0x10f   :  { %v353_v45 = vadd.f32 %v351_v43, %v192_v44 }
 0x111   :  { %2515 = vtanh.f32 %v353_v45  ;;  %v2214_v51 = vmul.f32 -1.442695, %v353_v45 }
 0x112   :  { %2517 = vpow2.f32 %v2213_v50 }
 0x113   :  { %2519 = vpow2.f32 %v2214_v51 }
 0x118   :  { %v2514_v46 = vpop.eup %2513 }
 0x119   :  { %368 = vrot.lane.b32.xlu0 %v2514_v46, %s2760_s4 }
 0x11e   :  { %v2516_v48 = vpop.eup %2515 }
 0x11f   :  { %398 = vrot.lane.b32.xlu0 %v2516_v48, %s2760_s4  ;;  %v2518_v52 = vpop.eup %2517 }
 0x120   :  { %v358_v53 = vadd.f32 1.0, %v2518_v52  ;;  %v2520_v54 = vpop.eup %2519 }
 0x121   :  { %v387_v55 = vadd.f32 1.0, %v2520_v54 }
 0x122   :  { %2521 = vrcp.f32 %v358_v53 }
 0x123   :  { %393 = vrot.lane.b32.xlu0 %v392_v49, %s2759_s2  ;;  %2523 = vrcp.f32 %v387_v55 }
 0x12f   :  { %v2522_v56 = vpop.eup %2521 }
 0x130   :  { %v2524_v59 = vpop.eup %2523  ;;  %v366_v63 = vmul.f32 %v2522_v56, %v364_v62 }
 0x18b   :  { %v369_v57 = vpop.permute.xlu0 %368 }
 0x18c   :  { %v371_v58 = vmul.f32 %v2522_v56, %v369_v57 }
 0x18e   :  { %373 = vrot.lane.b32.xlu1 %v371_v58, %s2759_s2 }
 0x191   :  { %v399_v60 = vpop.permute.xlu0 %398 }
 0x192   :  { %v401_v61 = vmul.f32 %v2524_v59, %v399_v60 }
 0x194   :  { %403 = vrot.lane.b32.xlu1 %v401_v61, %s2759_s2 }
 0x195   :  { %v394_v3 = vpop.permute.xlu0 %393 }
 0x196   :  { %v396_v4 = vmul.f32 %v2524_v59, %v394_v3 }
 0x200   :  { %v374_v1 = vpop.permute.xlu1 %373 }
 0x201   :  { %v376_v2 = vadd.f32 %v374_v1, %v366_v63 }
 0x203   :  { %2525 = vtanh.f32 %v376_v2 }
 0x206   :  { %v404_v5 = vpop.permute.xlu1 %403 }
 0x207   :  { %v406_v6 = vadd.f32 %v404_v5, %v396_v4 }
 0x209   :  { %2527 = vtanh.f32 %v406_v6 }
 0x210   :  { %v2526_v9 = vpop.eup %2525 }
 0x211   :  { %379 = vrot.lane.b32.xlu0 %v2526_v9, %s2760_s4 }
 0x216   :  { %v2528_v10 = vpop.eup %2527 }
 0x217   :  { %409 = vrot.lane.b32.xlu1 %v2528_v10, %s2760_s4 }
 0x283   :  { %v380_v12 = vpop.permute.xlu0 %379 }
 0x284   :  { %v382_v16 = vmul.f32 %v2522_v56, %v380_v12 }
 0x286   :  { %414 = vrot.lane.b32.xlu0 %v382_v16, %s2759_s2 }
 0x289   :  { %v410_v18 = vpop.permute.xlu1 %409 }
 0x28a   :  { %v2898_v20 = vmul.f32 %v2524_v59, %v410_v18  ;;  %419 = vrot.lane.b32.xlu0 %v376_v2, %s2761_s16 }
 0x28c   :  { %424 = vrot.lane.b32.xlu1 %v2898_v20, %s2759_s2 }
 0x290   :  { %430 = vrot.lane.b32.xlu1 %v406_v6, %s2761_s16 }
 0x2f8   :  { %v415_v21 = vpop.permute.xlu0 %414 }
 0x2f9   :  { %417 = vst.msk [vmem:[#allocation3] sm:$0x3] %vm186_vm0, %v415_v21  ;;  %434 = vst.msk [vmem:[#allocation15] sm:$0x3] %vm186_vm0, %v415_v21 }
 0x2fc   :  { %v420_v22 = vpop.permute.xlu0 %419 }
 0x2fd   :  { %422 = vst.msk [vmem:[#allocation4] sm:$0x3] %vm186_vm0, %v420_v22 }
 0x2fe   :  { %v425_v23 = vpop.permute.xlu1 %424 }
 0x2ff   :  { %428 = vst.msk [vmem:[#allocation5 - $0x6] sm:$0xc0] %vm427_vm3, %v425_v23  ;;  %v694_v23 = vld [vmem:[#allocation2 + $0x10] sm:$0x30] }
 0x300   :  { %v442_v24 = vld [vmem:[#allocation3] sm:$0x3] }
 0x301   :  { %2354 = vmatmul.mubr.msk.f32.vlgmr.msra.gmra.mxu1 %vm98_vm2, %v442_v24 }
 0x302   :  { %v431_v25 = vpop.permute.xlu1 %430  ;;  %2368 = vmatpush3.msra.mxu1 %v2826_v7  ;;  %2375 = vmatprep.mubr.msk.f32.mxu1 %vm2758_vm1, %v2757_v0 }
 0x303   :  { %433 = vst.msk [vmem:[#allocation6 - $0x6] sm:$0xc0] %vm427_vm3, %v431_v25  ;;  %2369 = vmatprep.subr.mxu1 %v2757_v0 }
 0x304   :  { %2370 = vmatpush3.msra.mxu1 %v2828_v8  ;;  %v606_v38 = vld [vmem:[#allocation4] sm:$0x3] }
 0x305   :  { %2371 = vmatprep.subr.mxu1 %v2757_v0  ;;  %v615_v39 = vrot.slane %v606_v38, 6 }
 0x306   :  { %v524_v26 = vld [vmem:[#allocation5] sm:$0x3]  ;;  %2372 = vmatpush3.msra.mxu1 %v2832_v11 }
 0x307   :  { %2365 = vmatmul.mubr.msk.f32.vlgmr.msra.gmra.mxu0 %vm98_vm2, %v524_v26  ;;  %2373 = vmatprep.subr.mxu1 %v2757_v0 }
 0x308   :  { %2374 = vmatpush3.msra.mxu1 %v2843_v15  ;;  %2379 = vmatpush3.msra.mxu0 %v2835_v13 }
 0x309   :  { %2380 = vmatprep.subr.mxu0 %v2757_v0  ;;  %2386 = vmatprep.mubr.msk.f32.mxu0 %vm2758_vm1, %v2757_v0 }
 0x30a   :  { %2381 = vmatpush3.msra.mxu0 %v2841_v14  ;;  %2389 = vmatprep.subr.mxu1 %v2757_v0  ;;  %v636_v40 = vld [vmem:[#allocation6] sm:$0x3] }
 0x30b   :  { %2382 = vmatprep.subr.mxu0 %v2757_v0  ;;  %v645_v42 = vrot.slane %v636_v40, 4 }
 0x30c   :  { %2383 = vmatpush3.msra.mxu0 %v2849_v17 }
 0x30d   :  { %2384 = vmatprep.subr.mxu0 %v2757_v0 }
 0x30e   :  { %2385 = vmatpush3.msra.mxu0 %v2855_v19 }
 0x30f   :  { %2400 = vmatprep.subr.mxu0 %v2757_v0 }
 0x3c1   :  { %v516_v27 = vpop.f32.mrf.mxu1 }
 0x3c2   :  { %v521_v28 = vrot.slane %v516_v27, 6 }
 0x3c3   :  { %v2355_v30 = vpop.f32.mrf.mxu1 }
 0x3c4   :  { %v523_v31 = vadd.f32 %v521_v28, %v440_v29  ;;  %v695_v28 = vld [vmem:[#allocation2 + $0x8] sm:$0xc] }
 0x3c6   :  { %2529 = vtanh.f32 %v523_v31  ;;  %v2217_v43 = vmul.f32 -1.442695, %v523_v31 }
 0x3c7   :  { %v598_v32 = vpop.f32.mrf.mxu0 }
 0x3c8   :  { %v603_v33 = vrot.slane %v598_v32, 4 }
 0x3c9   :  { %v2366_v35 = vpop.f32.mrf.mxu0 }
 0x3ca   :  { %v605_v36 = vadd.f32 %v603_v33, %v441_v34 }
 0x3cc   :  { %2531 = vtanh.f32 %v605_v36  ;;  %v2218_v44 = vmul.f32 -1.442695, %v605_v36 }
 0x3cd   :  { %2533 = vpow2.f32 %v2217_v43 }
 0x3ce   :  { %2535 = vpow2.f32 %v2218_v44 }
 0x3d3   :  { %v2530_v37 = vpop.eup %2529 }
 0x3d4   :  { %621 = vrot.lane.b32.xlu0 %v2530_v37, %s2760_s4 }
 0x3d8   :  { %616 = vrot.lane.b32.xlu0 %v615_v39, %s2759_s2 }
 0x3d9   :  { %v2532_v41 = vpop.eup %2531 }
 0x3da   :  { %651 = vrot.lane.b32.xlu1 %v2532_v41, %s2760_s4  ;;  %v2534_v45 = vpop.eup %2533 }
 0x3db   :  { %v610_v46 = vadd.f32 1.0, %v2534_v45  ;;  %v2536_v47 = vpop.eup %2535 }
 0x3dc   :  { %646 = vrot.lane.b32.xlu0 %v645_v42, %s2759_s2  ;;  %v640_v48 = vadd.f32 1.0, %v2536_v47 }
 0x3dd   :  { %2537 = vrcp.f32 %v610_v46 }
 0x3de   :  { %2539 = vrcp.f32 %v640_v48 }
 0x3ea   :  { %v2538_v49 = vpop.eup %2537 }
 0x3eb   :  { %v2540_v52 = vpop.eup %2539 }
 0x446   :  { %v622_v50 = vpop.permute.xlu0 %621 }
 0x447   :  { %v624_v51 = vmul.f32 %v2538_v49, %v622_v50 }
 0x449   :  { %626 = vrot.lane.b32.xlu1 %v624_v51, %s2759_s2 }
 0x44a   :  { %v617_v55 = vpop.permute.xlu0 %616 }
 0x44b   :  { %v619_v56 = vmul.f32 %v2538_v49, %v617_v55 }
 0x44c   :  { %v652_v53 = vpop.permute.xlu1 %651 }
 0x44d   :  { %v654_v54 = vmul.f32 %v2540_v52, %v652_v53 }
 0x44e   :  { %v647_v59 = vpop.permute.xlu0 %646 }
 0x44f   :  { %656 = vrot.lane.b32.xlu1 %v654_v54, %s2759_s2  ;;  %v649_v60 = vmul.f32 %v2540_v52, %v647_v59 }
 0x4bb   :  { %v627_v57 = vpop.permute.xlu1 %626 }
 0x4bc   :  { %v629_v58 = vadd.f32 %v627_v57, %v619_v56 }
 0x4be   :  { %2541 = vtanh.f32 %v629_v58 }
 0x4c1   :  { %v657_v61 = vpop.permute.xlu1 %656 }
 0x4c2   :  { %v659_v62 = vadd.f32 %v657_v61, %v649_v60 }
 0x4c4   :  { %2543 = vtanh.f32 %v659_v62 }
 0x4cb   :  { %v2542_v63 = vpop.eup %2541 }
 0x4cc   :  { %632 = vrot.lane.b32.xlu0 %v2542_v63, %s2760_s4 }
 0x4d1   :  { %v2544_v1 = vpop.eup %2543 }
 0x4d2   :  { %662 = vrot.lane.b32.xlu1 %v2544_v1, %s2760_s4 }
 0x53e   :  { %v633_v2 = vpop.permute.xlu0 %632 }
 0x53f   :  { %v635_v3 = vmul.f32 %v2538_v49, %v633_v2 }
 0x541   :  { %667 = vrot.lane.b32.xlu0 %v635_v3, %s2759_s2 }
 0x544   :  { %v663_v4 = vpop.permute.xlu1 %662 }
 0x545   :  { %v2940_v5 = vmul.f32 %v2540_v52, %v663_v4  ;;  %673 = vrot.lane.b32.xlu0 %v629_v58, %s2761_s16 }
 0x547   :  { %678 = vrot.lane.b32.xlu1 %v2940_v5, %s2759_s2 }
 0x54b   :  { %684 = vrot.lane.b32.xlu1 %v659_v62, %s2761_s16 }
 0x5b3   :  { %v668_v6 = vpop.permute.xlu0 %667 }
 0x5b4   :  { %671 = vst.msk [vmem:[#allocation3 - $0x2] sm:$0xc] %vm670_vm4, %v668_v6  ;;  %688 = vst.msk [vmem:[#allocation15] sm:$0xc] %vm670_vm4, %v668_v6 }
 0x5b7   :  { %v674_v9 = vpop.permute.xlu0 %673 }
 0x5b8   :  { %676 = vst.msk [vmem:[#allocation4 - $0x2] sm:$0xc] %vm670_vm4, %v674_v9 }
 0x5b9   :  { %v679_v10 = vpop.permute.xlu1 %678 }
 0x5ba   :  { %682 = vst.msk [vmem:[#allocation5 - $0x4] sm:$0x30] %vm681_vm5, %v679_v10 }
 0x5bb   :  { %v696_v12 = vld [vmem:[#allocation3] sm:$0x3] }
 0x5bc   :  { %2376 = vmatmul.mubr.msk.f32.vlgmr.msra.gmra.mxu1 %vm98_vm2, %v696_v12  ;;  %v946_v12 = vld [vmem:[#allocation2 + $0x10] sm:$0xc0] }
 0x5bd   :  { %v685_v16 = vpop.permute.xlu1 %684  ;;  %2390 = vmatpush3.msra.mxu1 %v2826_v7  ;;  %2397 = vmatprep.mubr.msk.f32.mxu1 %vm2758_vm1, %v2757_v0 }
 0x5be   :  { %687 = vst.msk [vmem:[#allocation6 - $0x4] sm:$0x30] %vm681_vm5, %v685_v16  ;;  %2391 = vmatprep.subr.mxu1 %v2757_v0 }
 0x5bf   :  { %2392 = vmatpush3.msra.mxu1 %v2828_v8  ;;  %v860_v32 = vld [vmem:[#allocation4] sm:$0x3] }
 0x5c0   :  { %2393 = vmatprep.subr.mxu1 %v2757_v0  ;;  %v869_v33 = vrot.slane %v860_v32, 4 }
 0x5c1   :  { %v778_v18 = vld [vmem:[#allocation5] sm:$0x3]  ;;  %2394 = vmatpush3.msra.mxu1 %v2832_v11 }
 0x5c2   :  { %2387 = vmatmul.mubr.msk.f32.vlgmr.msra.gmra.mxu0 %vm98_vm2, %v778_v18  ;;  %2395 = vmatprep.subr.mxu1 %v2757_v0 }
 0x5c3   :  { %2396 = vmatpush3.msra.mxu1 %v2843_v15  ;;  %2401 = vmatpush3.msra.mxu0 %v2835_v13 }
 0x5c4   :  { %2402 = vmatprep.subr.mxu0 %v2757_v0  ;;  %2408 = vmatprep.mubr.msk.f32.mxu0 %vm2758_vm1, %v2757_v0 }
 0x5c5   :  { %2403 = vmatpush3.msra.mxu0 %v2841_v14  ;;  %2411 = vmatprep.subr.mxu1 %v2757_v0  ;;  %v890_v34 = vld [vmem:[#allocation6] sm:$0x3] }
 0x5c6   :  { %2404 = vmatprep.subr.mxu0 %v2757_v0  ;;  %v899_v36 = vrot.slane %v890_v34, 6 }
 0x5c7   :  { %2405 = vmatpush3.msra.mxu0 %v2849_v17 }
 0x5c8   :  { %2406 = vmatprep.subr.mxu0 %v2757_v0 }
 0x5c9   :  { %2407 = vmatpush3.msra.mxu0 %v2855_v19 }
 0x5ca   :  { %2422 = vmatprep.subr.mxu0 %v2757_v0 }
 0x67c   :  { %v770_v21 = vpop.f32.mrf.mxu1 }
 0x67d   :  { %v775_v22 = vrot.slane %v770_v21, 4  ;;  %v947_v21 = vld [vmem:[#allocation2 + $0x8] sm:$0x3] }
 0x67e   :  { %v2377_v24 = vpop.f32.mrf.mxu1 }
 0x67f   :  { %v777_v25 = vadd.f32 %v775_v22, %v694_v23 }
 0x681   :  { %2545 = vtanh.f32 %v777_v25  ;;  %v2221_v37 = vmul.f32 -1.442695, %v777_v25 }
 0x682   :  { %v852_v26 = vpop.f32.mrf.mxu0 }
 0x683   :  { %v857_v27 = vrot.slane %v852_v26, 6 }
 0x684   :  { %v2388_v29 = vpop.f32.mrf.mxu0 }
 0x685   :  { %v859_v30 = vadd.f32 %v857_v27, %v695_v28 }
 0x687   :  { %2547 = vtanh.f32 %v859_v30  ;;  %v2222_v38 = vmul.f32 -1.442695, %v859_v30 }
 0x688   :  { %2549 = vpow2.f32 %v2221_v37 }
 0x689   :  { %2551 = vpow2.f32 %v2222_v38 }
 0x68e   :  { %v2546_v31 = vpop.eup %2545 }
 0x68f   :  { %875 = vrot.lane.b32.xlu0 %v2546_v31, %s2760_s4 }
 0x693   :  { %870 = vrot.lane.b32.xlu0 %v869_v33, %s2759_s2 }
 0x694   :  { %v2548_v35 = vpop.eup %2547 }
 0x695   :  { %905 = vrot.lane.b32.xlu1 %v2548_v35, %s2760_s4  ;;  %v2550_v39 = vpop.eup %2549 }
 0x696   :  { %v864_v40 = vadd.f32 1.0, %v2550_v39  ;;  %v2552_v41 = vpop.eup %2551 }
 0x697   :  { %900 = vrot.lane.b32.xlu0 %v899_v36, %s2759_s2  ;;  %v894_v42 = vadd.f32 1.0, %v2552_v41 }
 0x698   :  { %2553 = vrcp.f32 %v864_v40 }
 0x699   :  { %2555 = vrcp.f32 %v894_v42 }
 0x6a5   :  { %v2554_v43 = vpop.eup %2553 }
 0x6a6   :  { %v2556_v46 = vpop.eup %2555 }
 0x701   :  { %v876_v44 = vpop.permute.xlu0 %875 }
 0x702   :  { %v878_v45 = vmul.f32 %v2554_v43, %v876_v44 }
 0x704   :  { %880 = vrot.lane.b32.xlu1 %v878_v45, %s2759_s2 }
 0x705   :  { %v871_v49 = vpop.permute.xlu0 %870 }
 0x706   :  { %v873_v50 = vmul.f32 %v2554_v43, %v871_v49 }
 0x707   :  { %v906_v47 = vpop.permute.xlu1 %905 }
 0x708   :  { %v908_v48 = vmul.f32 %v2556_v46, %v906_v47 }
 0x709   :  { %v901_v53 = vpop.permute.xlu0 %900 }
 0x70a   :  { %910 = vrot.lane.b32.xlu1 %v908_v48, %s2759_s2  ;;  %v903_v54 = vmul.f32 %v2556_v46, %v901_v53 }
 0x776   :  { %v881_v51 = vpop.permute.xlu1 %880 }
 0x777   :  { %v883_v52 = vadd.f32 %v881_v51, %v873_v50 }
 0x779   :  { %2557 = vtanh.f32 %v883_v52 }
 0x77c   :  { %v911_v55 = vpop.permute.xlu1 %910 }
 0x77d   :  { %v913_v56 = vadd.f32 %v911_v55, %v903_v54 }
 0x77f   :  { %2559 = vtanh.f32 %v913_v56 }
 0x786   :  { %v2558_v57 = vpop.eup %2557 }
 0x787   :  { %886 = vrot.lane.b32.xlu0 %v2558_v57, %s2760_s4 }
 0x78c   :  { %v2560_v58 = vpop.eup %2559 }
 0x78d   :  { %916 = vrot.lane.b32.xlu1 %v2560_v58, %s2760_s4 }
 0x7f9   :  { %v887_v59 = vpop.permute.xlu0 %886 }
 0x7fa   :  { %v889_v60 = vmul.f32 %v2554_v43, %v887_v59 }
 0x7fc   :  { %921 = vrot.lane.b32.xlu0 %v889_v60, %s2759_s2 }
 0x7ff   :  { %v917_v61 = vpop.permute.xlu1 %916 }
 0x800   :  { %v2982_v62 = vmul.f32 %v2556_v46, %v917_v61  ;;  %926 = vrot.lane.b32.xlu0 %v883_v52, %s2761_s16 }
 0x802   :  { %931 = vrot.lane.b32.xlu1 %v2982_v62, %s2759_s2 }
 0x806   :  { %936 = vrot.lane.b32.xlu1 %v913_v56, %s2761_s16 }
 0x86e   :  { %v922_v63 = vpop.permute.xlu0 %921 }
 0x86f   :  { %924 = vst.msk [vmem:[#allocation3 - $0x4] sm:$0x30] %vm681_vm5, %v922_v63  ;;  %940 = vst.msk [vmem:[#allocation15] sm:$0x30] %vm681_vm5, %v922_v63  ;;  %v1195_v63 = vld [vmem:[#allocation2] sm:$0xc0] }
 0x872   :  { %v927_v1 = vpop.permute.xlu0 %926 }
 0x873   :  { %929 = vst.msk [vmem:[#allocation4 - $0x4] sm:$0x30] %vm681_vm5, %v927_v1 }
 0x874   :  { %v932_v2 = vpop.permute.xlu1 %931 }
 0x875   :  { %934 = vst.msk [vmem:[#allocation5 - $0x2] sm:$0xc] %vm670_vm4, %v932_v2 }
 0x876   :  { %v948_v3 = vld [vmem:[#allocation3] sm:$0x3] }
 0x877   :  { %2398 = vmatmul.mubr.msk.f32.vlgmr.msra.gmra.mxu1 %vm98_vm2, %v948_v3 }
 0x878   :  { %v937_v4 = vpop.permute.xlu1 %936  ;;  %2412 = vmatpush3.msra.mxu1 %v2826_v7  ;;  %2419 = vmatprep.mubr.msk.f32.mxu1 %vm2758_vm1, %v2757_v0 }
 0x879   :  { %939 = vst.msk [vmem:[#allocation6 - $0x2] sm:$0xc] %vm670_vm4, %v937_v4  ;;  %2413 = vmatprep.subr.mxu1 %v2757_v0 }
 0x87a   :  { %2414 = vmatpush3.msra.mxu1 %v2828_v8  ;;  %v1109_v26 = vld [vmem:[#allocation4] sm:$0x3] }
 0x87b   :  { %2415 = vmatprep.subr.mxu1 %v2757_v0  ;;  %v1118_v27 = vrot.slane %v1109_v26, 2 }
 0x87c   :  { %v1030_v6 = vld [vmem:[#allocation5] sm:$0x3]  ;;  %2416 = vmatpush3.msra.mxu1 %v2832_v11 }
 0x87d   :  { %2409 = vmatmul.mubr.msk.f32.vlgmr.msra.gmra.mxu0 %vm98_vm2, %v1030_v6  ;;  %2417 = vmatprep.subr.mxu1 %v2757_v0 }
 0x87e   :  { %2423 = vmatpush3.msra.mxu0 %v2835_v13  ;;  %2418 = vmatpush3.msra.mxu1 %v2843_v15 }
 0x87f   :  { %2424 = vmatprep.subr.mxu0 %v2757_v0  ;;  %2430 = vmatprep.mubr.msk.f32.mxu0 %vm2758_vm1, %v2757_v0 }
 0x880   :  { %2425 = vmatpush3.msra.mxu0 %v2841_v14  ;;  %2433 = vmatprep.subr.mxu1 %v2757_v0  ;;  %v1139_v29 = vld [vmem:[#allocation6] sm:$0x3] }
 0x881   :  { %2426 = vmatprep.subr.mxu0 %v2757_v0 }
 0x882   :  { %2427 = vmatpush3.msra.mxu0 %v2849_v17 }
 0x883   :  { %2428 = vmatprep.subr.mxu0 %v2757_v0 }
 0x884   :  { %2429 = vmatpush3.msra.mxu0 %v2855_v19 }
 0x885   :  { %2444 = vmatprep.subr.mxu0 %v2757_v0 }
 0x937   :  { %v1022_v9 = vpop.f32.mrf.mxu1 }
 0x938   :  { %v1027_v10 = vrot.slane %v1022_v9, 2 }
 0x939   :  { %v2399_v16 = vpop.f32.mrf.mxu1 }
 0x93a   :  { %v1029_v18 = vadd.f32 %v1027_v10, %v946_v12 }
 0x93c   :  { %2561 = vtanh.f32 %v1029_v18  ;;  %v2225_v30 = vmul.f32 -1.442695, %v1029_v18 }
 0x93d   :  { %v1104_v22 = vpop.f32.mrf.mxu0 }
 0x93e   :  { %v1108_v23 = vadd.f32 %v1104_v22, %v947_v21 }
 0x93f   :  { %v2410_v24 = vpop.f32.mrf.mxu0 }
 0x940   :  { %2563 = vtanh.f32 %v1108_v23  ;;  %v2226_v31 = vmul.f32 -1.442695, %v1108_v23 }
 0x941   :  { %2565 = vpow2.f32 %v2225_v30 }
 0x942   :  { %2567 = vpow2.f32 %v2226_v31 }
 0x949   :  { %v2562_v25 = vpop.eup %2561 }
 0x94a   :  { %1124 = vrot.lane.b32.xlu0 %v2562_v25, %s2760_s4 }
 0x94d   :  { %v2564_v28 = vpop.eup %2563 }
 0x94e   :  { %1153 = vrot.lane.b32.xlu1 %v2564_v28, %s2760_s4  ;;  %1119 = vrot.lane.b32.xlu0 %v1118_v27, %s2759_s2  ;;  %v2566_v32 = vpop.eup %2565 }
 0x94f   :  { %v1113_v33 = vadd.f32 1.0, %v2566_v32  ;;  %v2568_v34 = vpop.eup %2567 }
 0x950   :  { %v1143_v35 = vadd.f32 1.0, %v2568_v34 }
 0x951   :  { %2569 = vrcp.f32 %v1113_v33 }
 0x952   :  { %1148 = vrot.lane.b32.xlu1 %v1139_v29, %s2759_s2  ;;  %2571 = vrcp.f32 %v1143_v35 }
 0x95e   :  { %v2570_v36 = vpop.eup %2569 }
 0x95f   :  { %v2572_v39 = vpop.eup %2571 }
 0x9bc   :  { %v1125_v37 = vpop.permute.xlu0 %1124 }
 0x9bd   :  { %v1127_v38 = vmul.f32 %v2570_v36, %v1125_v37 }
 0x9bf   :  { %1129 = vrot.lane.b32.xlu0 %v1127_v38, %s2759_s2 }
 0x9c0   :  { %v1154_v40 = vpop.permute.xlu1 %1153  ;;  %v1120_v42 = vpop.permute.xlu0 %1119 }
 0x9c1   :  { %v1156_v41 = vmul.f32 %v2572_v39, %v1154_v40  ;;  %v1122_v43 = vmul.f32 %v2570_v36, %v1120_v42 }
 0x9c3   :  { %1158 = vrot.lane.b32.xlu1 %v1156_v41, %s2759_s2 }
 0x9c4   :  { %v1149_v44 = vpop.permute.xlu1 %1148 }
 0x9c5   :  { %v1151_v47 = vmul.f32 %v2572_v39, %v1149_v44 }
 0xa31   :  { %v1130_v45 = vpop.permute.xlu0 %1129 }
 0xa32   :  { %v1132_v46 = vadd.f32 %v1130_v45, %v1122_v43 }
 0xa34   :  { %2573 = vtanh.f32 %v1132_v46 }
 0xa35   :  { %v1159_v48 = vpop.permute.xlu1 %1158 }
 0xa36   :  { %v1161_v49 = vadd.f32 %v1159_v48, %v1151_v47 }
 0xa38   :  { %2575 = vtanh.f32 %v1161_v49 }
 0xa41   :  { %v2574_v50 = vpop.eup %2573 }
 0xa42   :  { %1135 = vrot.lane.b32.xlu0 %v2574_v50, %s2760_s4  ;;  %v1441_v50 = vld [vmem:[#allocation2 + $0x18] sm:$0xc] }
 0xa45   :  { %v2576_v51 = vpop.eup %2575 }
 0xa46   :  { %1164 = vrot.lane.b32.xlu1 %v2576_v51, %s2760_s4 }
 0xab4   :  { %v1136_v52 = vpop.permute.xlu0 %1135 }
 0xab5   :  { %v1138_v53 = vmul.f32 %v2570_v36, %v1136_v52 }
 0xab7   :  { %1169 = vrot.lane.b32.xlu0 %v1138_v53, %s2759_s2 }
 0xab8   :  { %v1165_v54 = vpop.permute.xlu1 %1164 }
 0xab9   :  { %v3024_v55 = vmul.f32 %v2572_v39, %v1165_v54 }
 0xabb   :  { %1179 = vrot.lane.b32.xlu1 %v3024_v55, %s2759_s2  ;;  %1174 = vrot.lane.b32.xlu0 %v1132_v46, %s2761_s16 }
 0xabf   :  { %1184 = vrot.lane.b32.xlu1 %v1161_v49, %s2761_s16 }
 0xb29   :  { %v1170_v56 = vpop.permute.xlu0 %1169 }
 0xb2a   :  { %1172 = vst.msk [vmem:[#allocation3 - $0x6] sm:$0xc0] %vm427_vm3, %v1170_v56  ;;  %1188 = vst.msk [vmem:[#allocation15] sm:$0xc0] %vm427_vm3, %v1170_v56  ;;  %v1442_v56 = vld [vmem:[#allocation2] sm:$0x30] }
 0xb2d   :  { %v1180_v57 = vpop.permute.xlu1 %1179  ;;  %v1175_v58 = vpop.permute.xlu0 %1174 }
 0xb2e   :  { %1182 = vst.msk [vmem:[#allocation5] sm:$0x3] %vm186_vm0, %v1180_v57 }
 0xb2f   :  { %1177 = vst.msk [vmem:[#allocation4 - $0x6] sm:$0xc0] %vm427_vm3, %v1175_v58 }
 0xb31   :  { %v1185_v59 = vpop.permute.xlu1 %1184  ;;  %v1196_v60 = vld [vmem:[#allocation3] sm:$0x3] }
 0xb32   :  { %1187 = vst.msk [vmem:[#allocation6] sm:$0x3] %vm186_vm0, %v1185_v59  ;;  %2420 = vmatmul.mubr.msk.f32.vlgmr.msra.gmra.mxu1 %vm98_vm2, %v1196_v60 }
 0xb33   :  { %2434 = vmatpush3.msra.mxu1 %v2826_v7  ;;  %2441 = vmatprep.mubr.msk.f32.mxu1 %vm2758_vm1, %v2757_v0  ;;  %v1194_v7 = vld [vmem:[#allocation2 + $0x18] sm:$0x3] }
 0xb34   :  { %2435 = vmatprep.subr.mxu1 %v2757_v0 }
 0xb35   :  { %v1275_v61 = vld [vmem:[#allocation5] sm:$0x3]  ;;  %2436 = vmatpush3.msra.mxu1 %v2828_v8 }
 0xb36   :  { %2431 = vmatmul.mubr.msk.f32.vlgmr.msra.gmra.mxu0 %vm98_vm2, %v1275_v61  ;;  %2437 = vmatprep.subr.mxu1 %v2757_v0  ;;  %v1357_v3 = vld [vmem:[#allocation4] sm:$0x3] }
 0xb37   :  { %2438 = vmatpush3.msra.mxu1 %v2832_v11  ;;  %2445 = vmatpush3.msra.mxu0 %v2835_v13 }
 0xb38   :  { %2439 = vmatprep.subr.mxu1 %v2757_v0  ;;  %2446 = vmatprep.subr.mxu0 %v2757_v0 }
 0xb39   :  { %2440 = vmatpush3.msra.mxu1 %v2843_v15  ;;  %2447 = vmatpush3.msra.mxu0 %v2841_v14  ;;  %v1386_v4 = vld [vmem:[#allocation6] sm:$0x3] }
 0xb3a   :  { %2448 = vmatprep.subr.mxu0 %v2757_v0  ;;  %2452 = vmatprep.mubr.msk.f32.mxu0 %vm2758_vm1, %v2757_v0  ;;  %v1395_v6 = vrot.slane %v1386_v4, 2 }
 0xb3b   :  { %2449 = vmatpush3.msra.mxu0 %v2849_v17  ;;  %2455 = vmatprep.subr.mxu1 %v2757_v0 }
 0xb3c   :  { %2450 = vmatprep.subr.mxu0 %v2757_v0 }
 0xb3d   :  { %2451 = vmatpush3.msra.mxu0 %v2855_v19 }
 0xb3e   :  { %2466 = vmatprep.subr.mxu0 %v2757_v0 }
 0xbf2   :  { %v1270_v8 = vpop.f32.mrf.mxu1 }
 0xbf3   :  { %v1274_v11 = vadd.f32 %v1270_v8, %v1194_v7 }
 0xbf4   :  { %v2421_v13 = vpop.f32.mrf.mxu1 }
 0xbf5   :  { %2577 = vtanh.f32 %v1274_v11  ;;  %v2229_v9 = vmul.f32 -1.442695, %v1274_v11 }
 0xbf6   :  { %v1349_v14 = vpop.f32.mrf.mxu0 }
 0xbf7   :  { %v1354_v15 = vrot.slane %v1349_v14, 2 }
 0xbf8   :  { %v2432_v1 = vpop.f32.mrf.mxu0 }
 0xbf9   :  { %v1356_v2 = vadd.f32 %v1354_v15, %v1195_v63 }
 0xbfb   :  { %2579 = vtanh.f32 %v1356_v2  ;;  %v2230_v10 = vmul.f32 -1.442695, %v1356_v2 }
 0xbfc   :  { %2581 = vpow2.f32 %v2229_v9 }
 0xbfd   :  { %2583 = vpow2.f32 %v2230_v10 }
 0xc02   :  { %v2578_v17 = vpop.eup %2577 }
 0xc03   :  { %1371 = vrot.lane.b32.xlu0 %v2578_v17, %s2760_s4 }
 0xc07   :  { %1366 = vrot.lane.b32.xlu0 %v1357_v3, %s2759_s2 }
 0xc08   :  { %v2580_v19 = vpop.eup %2579 }
 0xc09   :  { %1401 = vrot.lane.b32.xlu1 %v2580_v19, %s2760_s4  ;;  %v2582_v12 = vpop.eup %2581 }
 0xc0a   :  { %v1361_v16 = vadd.f32 1.0, %v2582_v12  ;;  %v2584_v18 = vpop.eup %2583 }
 0xc0b   :  { %1396 = vrot.lane.b32.xlu0 %v1395_v6, %s2759_s2  ;;  %v1390_v21 = vadd.f32 1.0, %v2584_v18 }
 0xc0c   :  { %2585 = vrcp.f32 %v1361_v16 }
 0xc0d   :  { %2587 = vrcp.f32 %v1390_v21 }
 0xc19   :  { %v2586_v22 = vpop.eup %2585 }
 0xc1a   :  { %v2588_v25 = vpop.eup %2587 }
 0xc75   :  { %v1372_v23 = vpop.permute.xlu0 %1371 }
 0xc76   :  { %v1374_v24 = vmul.f32 %v2586_v22, %v1372_v23 }
 0xc78   :  { %1376 = vrot.lane.b32.xlu1 %v1374_v24, %s2759_s2 }
 0xc79   :  { %v1367_v28 = vpop.permute.xlu0 %1366 }
 0xc7a   :  { %v1369_v29 = vmul.f32 %v2586_v22, %v1367_v28  ;;  %v1697_v28 = vld [vmem:[#allocation12 + $0x10] sm:$0xff] }
 0xc7b   :  { %v1402_v26 = vpop.permute.xlu1 %1401 }
 0xc7c   :  { %v1404_v27 = vmul.f32 %v2588_v25, %v1402_v26 }
 0xc7d   :  { %v1397_v32 = vpop.permute.xlu0 %1396 }
 0xc7e   :  { %1406 = vrot.lane.b32.xlu1 %v1404_v27, %s2759_s2  ;;  %v1399_v33 = vmul.f32 %v2588_v25, %v1397_v32  ;;  %v1698_v27 = vld [vmem:[#allocation12 + $0x18] sm:$0xff]  ;;  %v1779_v32 = vld [vmem:[#allocation13 + $0x10] sm:$0xff] }
 0xcea   :  { %v1377_v30 = vpop.permute.xlu1 %1376 }
 0xceb   :  { %v1379_v31 = vadd.f32 %v1377_v30, %v1369_v29  ;;  %v1696_v29 = vld [vmem:[#allocation12 + $0x8] sm:$0xff]  ;;  %v1695_v30 = vld [vmem:[#allocation12] sm:$0xff] }
 0xced   :  { %2589 = vtanh.f32 %v1379_v31 }
 0xcf0   :  { %v1407_v34 = vpop.permute.xlu1 %1406 }
 0xcf1   :  { %v1409_v35 = vadd.f32 %v1407_v34, %v1399_v33  ;;  %v1778_v34 = vld [vmem:[#allocation13 + $0x8] sm:$0xff] }
 0xcf3   :  { %2591 = vtanh.f32 %v1409_v35 }
 0xcfa   :  { %v2590_v36 = vpop.eup %2589 }
 0xcfb   :  { %1382 = vrot.lane.b32.xlu0 %v2590_v36, %s2760_s4 }
 0xd00   :  { %v2592_v37 = vpop.eup %2591 }
 0xd01   :  { %1412 = vrot.lane.b32.xlu1 %v2592_v37, %s2760_s4 }
 0xd6d   :  { %v1383_v38 = vpop.permute.xlu0 %1382 }
 0xd6e   :  { %v1385_v39 = vmul.f32 %v2586_v22, %v1383_v38 }
 0xd70   :  { %1417 = vrot.lane.b32.xlu0 %v1385_v39, %s2759_s2 }
 0xd73   :  { %v1413_v40 = vpop.permute.xlu1 %1412 }
 0xd74   :  { %v3066_v41 = vmul.f32 %v2588_v25, %v1413_v40  ;;  %1422 = vrot.lane.b32.xlu0 %v1379_v31, %s2761_s16  ;;  %v1780_v31 = vld [vmem:[#allocation13 + $0x18] sm:$0xff] }
 0xd76   :  { %1427 = vrot.lane.b32.xlu1 %v3066_v41, %s2759_s2 }
 0xd7a   :  { %1432 = vrot.lane.b32.xlu1 %v1409_v35, %s2761_s16  ;;  %v1777_v35 = vld [vmem:[#allocation13] sm:$0xff] }
 0xde2   :  { %v3072_v42 = vpop.permute.xlu0 %1417 }
 0xde3   :  { %1420 = vst.msk [vmem:[#allocation3] sm:$0x3] %vm186_vm0, %v3072_v42 }
 0xde6   :  { %v1423_v43 = vpop.permute.xlu0 %1422 }
 0xde7   :  { %1425 = vst.msk [vmem:[#allocation4] sm:$0x3] %vm186_vm0, %v1423_v43 }
 0xde8   :  { %v1428_v44 = vpop.permute.xlu1 %1427 }
 0xde9   :  { %1430 = vst.msk [vmem:[#allocation5 - $0x6] sm:$0xc0] %vm427_vm3, %v1428_v44 }
 0xdea   :  { %v1443_v45 = vld [vmem:[#allocation3] sm:$0x3] }
 0xdeb   :  { %2442 = vmatmul.mubr.msk.f32.vlgmr.msra.gmra.mxu1 %vm98_vm2, %v1443_v45 }
 0xdec   :  { %v1433_v46 = vpop.permute.xlu1 %1432  ;;  %2463 = vmatprep.mubr.msk.f32.mxu1 %vm2758_vm1, %v2757_v0  ;;  %2456 = vmatpush3.msra.mxu1 %v1698_v27 }
 0xded   :  { %1435 = vst.msk [vmem:[#allocation6 - $0x6] sm:$0xc0] %vm427_vm3, %v1433_v46  ;;  %2457 = vmatprep.subr.mxu1 %v2757_v0 }
 0xdee   :  { %v1607_v60 = vld [vmem:[#allocation4] sm:$0x3]  ;;  %2458 = vmatpush3.msra.mxu1 %v1697_v28 }
 0xdef   :  { %v1616_v61 = vrot.slane %v1607_v60, 6  ;;  %2459 = vmatprep.subr.mxu1 %v2757_v0 }
 0xdf0   :  { %v1525_v47 = vld [vmem:[#allocation5] sm:$0x3]  ;;  %2460 = vmatpush3.msra.mxu1 %v1696_v29 }
 0xdf1   :  { %2453 = vmatmul.mubr.msk.f32.vlgmr.msra.gmra.mxu0 %vm98_vm2, %v1525_v47  ;;  %2461 = vmatprep.subr.mxu1 %v2757_v0 }
 0xdf2   :  { %2474 = vmatprep.mubr.msk.f32.mxu0 %vm2758_vm1, %v2757_v0  ;;  %2462 = vmatpush3.msra.mxu1 %v1695_v30 }
 0xdf3   :  { %2467 = vmatpush3.msra.mxu0 %v1780_v31  ;;  %2477 = vmatprep.subr.mxu1 %v2757_v0 }
 0xdf4   :  { %v1637_v7 = vld [vmem:[#allocation6] sm:$0x3]  ;;  %2468 = vmatprep.subr.mxu0 %v2757_v0 }
 0xdf5   :  { %v1646_v11 = vrot.slane %v1637_v7, 4  ;;  %2469 = vmatpush3.msra.mxu0 %v1779_v32 }
 0xdf6   :  { %2470 = vmatprep.subr.mxu0 %v2757_v0 }
 0xdf7   :  { %2471 = vmatpush3.msra.mxu0 %v1778_v34 }
 0xdf8   :  { %2472 = vmatprep.subr.mxu0 %v2757_v0 }
 0xdf9   :  { %2473 = vmatpush3.msra.mxu0 %v1777_v35 }
 0xdfa   :  { %2488 = vmatprep.subr.mxu0 %v2757_v0 }
 0xeab   :  { %v1517_v48 = vpop.f32.mrf.mxu1 }
 0xeac   :  { %v1522_v49 = vrot.slane %v1517_v48, 6 }
 0xead   :  { %v2443_v51 = vpop.f32.mrf.mxu1 }
 0xeae   :  { %v1524_v52 = vadd.f32 %v1522_v49, %v1441_v50  ;;  %v1692_v49 = vld [vmem:[#allocation2 + $0x18] sm:$0x30] }
 0xeb0   :  { %2593 = vtanh.f32 %v1524_v52  ;;  %v2233_v13 = vmul.f32 -1.442695, %v1524_v52 }
 0xeb1   :  { %v1599_v53 = vpop.f32.mrf.mxu0 }
 0xeb2   :  { %v1604_v54 = vrot.slane %v1599_v53, 4 }
 0xeb3   :  { %v2454_v57 = vpop.f32.mrf.mxu0 }
 0xeb4   :  { %v1606_v58 = vadd.f32 %v1604_v54, %v1442_v56  ;;  %v1693_v54 = vld [vmem:[#allocation2] sm:$0xc] }
 0xeb6   :  { %2595 = vtanh.f32 %v1606_v58  ;;  %v2234_v14 = vmul.f32 -1.442695, %v1606_v58 }
 0xeb7   :  { %2597 = vpow2.f32 %v2233_v13 }
 0xeb8   :  { %2599 = vpow2.f32 %v2234_v14 }
 0xebd   :  { %v2594_v59 = vpop.eup %2593 }
 0xebe   :  { %1622 = vrot.lane.b32.xlu0 %v2594_v59, %s2760_s4 }
 0xec2   :  { %1617 = vrot.lane.b32.xlu0 %v1616_v61, %s2759_s2 }
 0xec3   :  { %v2596_v8 = vpop.eup %2595 }
 0xec4   :  { %1652 = vrot.lane.b32.xlu1 %v2596_v8, %s2760_s4  ;;  %v2598_v15 = vpop.eup %2597 }
 0xec5   :  { %v1611_v63 = vadd.f32 1.0, %v2598_v15  ;;  %v2600_v1 = vpop.eup %2599 }
 0xec6   :  { %1647 = vrot.lane.b32.xlu0 %v1646_v11, %s2759_s2  ;;  %v1641_v2 = vadd.f32 1.0, %v2600_v1 }
 0xec7   :  { %2601 = vrcp.f32 %v1611_v63 }
 0xec8   :  { %2603 = vrcp.f32 %v1641_v2 }
 0xed4   :  { %v2602_v17 = vpop.eup %2601 }
 0xed5   :  { %v2604_v19 = vpop.eup %2603 }
 0xf30   :  { %v1623_v3 = vpop.permute.xlu0 %1622 }
 0xf31   :  { %v1625_v4 = vmul.f32 %v2602_v17, %v1623_v3 }
 0xf33   :  { %1627 = vrot.lane.b32.xlu1 %v1625_v4, %s2759_s2 }
 0xf34   :  { %v1618_v10 = vpop.permute.xlu0 %1617 }
 0xf35   :  { %v1620_v12 = vmul.f32 %v2602_v17, %v1618_v10 }
 0xf36   :  { %v1653_v6 = vpop.permute.xlu1 %1652 }
 0xf37   :  { %v1655_v9 = vmul.f32 %v2604_v19, %v1653_v6 }
 0xf38   :  { %v1648_v21 = vpop.permute.xlu0 %1647 }
 0xf39   :  { %1657 = vrot.lane.b32.xlu1 %v1655_v9, %s2759_s2  ;;  %v1650_v22 = vmul.f32 %v2604_v19, %v1648_v21 }
 0xfa5   :  { %v1628_v16 = vpop.permute.xlu1 %1627 }
 0xfa6   :  { %v1630_v18 = vadd.f32 %v1628_v16, %v1620_v12 }
 0xfa8   :  { %2605 = vtanh.f32 %v1630_v18 }
 0xfab   :  { %v1658_v23 = vpop.permute.xlu1 %1657 }
 0xfac   :  { %v1660_v24 = vadd.f32 %v1658_v23, %v1650_v22 }
 0xfae   :  { %2607 = vtanh.f32 %v1660_v24 }
 0xfb5   :  { %v2606_v25 = vpop.eup %2605 }
 0xfb6   :  { %1633 = vrot.lane.b32.xlu0 %v2606_v25, %s2760_s4 }
 0xfbb   :  { %v2608_v26 = vpop.eup %2607 }
 0xfbc   :  { %1663 = vrot.lane.b32.xlu1 %v2608_v26, %s2760_s4 }
0x1028   :  { %v1634_v33 = vpop.permute.xlu0 %1633 }
0x1029   :  { %v1636_v36 = vmul.f32 %v2602_v17, %v1634_v33 }
0x102b   :  { %1668 = vrot.lane.b32.xlu0 %v1636_v36, %s2759_s2 }
0x102e   :  { %v1664_v37 = vpop.permute.xlu1 %1663 }
0x102f   :  { %v3102_v38 = vmul.f32 %v2604_v19, %v1664_v37  ;;  %1673 = vrot.lane.b32.xlu0 %v1630_v18, %s2761_s16  ;;  %v1943_v37 = vld [vmem:[#allocation2 + $0x18] sm:$0xc0] }
0x1031   :  { %1678 = vrot.lane.b32.xlu1 %v3102_v38, %s2759_s2 }
0x1035   :  { %1683 = vrot.lane.b32.xlu1 %v1660_v24, %s2761_s16 }
0x109d   :  { %v3108_v39 = vpop.permute.xlu0 %1668 }
0x109e   :  { %1671 = vst.msk [vmem:[#allocation3 - $0x2] sm:$0xc] %vm670_vm4, %v3108_v39 }
0x10a1   :  { %v1674_v40 = vpop.permute.xlu0 %1673 }
0x10a2   :  { %1676 = vst.msk [vmem:[#allocation4 - $0x2] sm:$0xc] %vm670_vm4, %v1674_v40 }
0x10a3   :  { %v1679_v43 = vpop.permute.xlu1 %1678 }
0x10a4   :  { %1681 = vst.msk [vmem:[#allocation5 - $0x4] sm:$0x30] %vm681_vm5, %v1679_v43 }
0x10a5   :  { %v1694_v44 = vld [vmem:[#allocation3] sm:$0x3] }
0x10a6   :  { %2464 = vmatmul.mubr.msk.f32.vlgmr.msra.gmra.mxu1 %vm98_vm2, %v1694_v44  ;;  %v1944_v44 = vld [vmem:[#allocation2] sm:$0x3] }
0x10a7   :  { %v1684_v45 = vpop.permute.xlu1 %1683  ;;  %2478 = vmatpush3.msra.mxu1 %v1698_v27  ;;  %2485 = vmatprep.mubr.msk.f32.mxu1 %vm2758_vm1, %v2757_v0 }
0x10a8   :  { %1686 = vst.msk [vmem:[#allocation6 - $0x4] sm:$0x30] %vm681_vm5, %v1684_v45  ;;  %2479 = vmatprep.subr.mxu1 %v2757_v0 }
0x10a9   :  { %2480 = vmatpush3.msra.mxu1 %v1697_v28  ;;  %v1858_v59 = vld [vmem:[#allocation4] sm:$0x3] }
0x10aa   :  { %2481 = vmatprep.subr.mxu1 %v2757_v0  ;;  %v1867_v60 = vrot.slane %v1858_v59, 4 }
0x10ab   :  { %v1776_v46 = vld [vmem:[#allocation5] sm:$0x3]  ;;  %2482 = vmatpush3.msra.mxu1 %v1696_v29 }
0x10ac   :  { %2475 = vmatmul.mubr.msk.f32.vlgmr.msra.gmra.mxu0 %vm98_vm2, %v1776_v46  ;;  %2483 = vmatprep.subr.mxu1 %v2757_v0 }
0x10ad   :  { %2484 = vmatpush3.msra.mxu1 %v1695_v30  ;;  %2489 = vmatpush3.msra.mxu0 %v1780_v31 }
0x10ae   :  { %2490 = vmatprep.subr.mxu0 %v2757_v0  ;;  %2496 = vmatprep.mubr.msk.f32.mxu0 %vm2758_vm1, %v2757_v0 }
0x10af   :  { %2491 = vmatpush3.msra.mxu0 %v1779_v32  ;;  %v1888_v61 = vld [vmem:[#allocation6] sm:$0x3] }
0x10b0   :  { %2492 = vmatprep.subr.mxu0 %v2757_v0  ;;  %v1897_v7 = vrot.slane %v1888_v61, 6 }
0x10b1   :  { %2493 = vmatpush3.msra.mxu0 %v1778_v34 }
0x10b2   :  { %2494 = vmatprep.subr.mxu0 %v2757_v0 }
0x10b3   :  { %2495 = vmatpush3.msra.mxu0 %v1777_v35 }
0x1166   :  { %v1768_v47 = vpop.f32.mrf.mxu1 }
0x1167   :  { %v1773_v48 = vrot.slane %v1768_v47, 4 }
0x1168   :  { %v2465_v50 = vpop.f32.mrf.mxu1 }
0x1169   :  { %v1775_v51 = vadd.f32 %v1773_v48, %v1692_v49 }
0x116b   :  { %2609 = vtanh.f32 %v1775_v51  ;;  %v2237_v8 = vmul.f32 -1.442695, %v1775_v51 }
0x116c   :  { %v1850_v52 = vpop.f32.mrf.mxu0 }
0x116d   :  { %v1855_v53 = vrot.slane %v1850_v52, 6 }
0x116e   :  { %v2476_v56 = vpop.f32.mrf.mxu0 }
0x116f   :  { %v1857_v57 = vadd.f32 %v1855_v53, %v1693_v54 }
0x1171   :  { %2611 = vtanh.f32 %v1857_v57  ;;  %v2238_v11 = vmul.f32 -1.442695, %v1857_v57 }
0x1172   :  { %2613 = vpow2.f32 %v2237_v8 }
0x1173   :  { %2615 = vpow2.f32 %v2238_v11 }
0x1178   :  { %v2610_v58 = vpop.eup %2609 }
0x1179   :  { %1873 = vrot.lane.b32.xlu0 %v2610_v58, %s2760_s4 }
0x117d   :  { %1868 = vrot.lane.b32.xlu0 %v1867_v60, %s2759_s2 }
0x117e   :  { %v2612_v0 = vpop.eup %2611 }
0x117f   :  { %1903 = vrot.lane.b32.xlu1 %v2612_v0, %s2760_s4  ;;  %v2614_v13 = vpop.eup %2613 }
0x1180   :  { %v1862_v14 = vadd.f32 1.0, %v2614_v13  ;;  %v2616_v15 = vpop.eup %2615 }
0x1181   :  { %1898 = vrot.lane.b32.xlu0 %v1897_v7, %s2759_s2  ;;  %v1892_v63 = vadd.f32 1.0, %v2616_v15 }
0x1182   :  { %2617 = vrcp.f32 %v1862_v14 }
0x1183   :  { %2619 = vrcp.f32 %v1892_v63 }
0x118f   :  { %v2618_v1 = vpop.eup %2617 }
0x1190   :  { %v2620_v3 = vpop.eup %2619 }
0x11eb   :  { %v1874_v2 = vpop.permute.xlu0 %1873 }
0x11ec   :  { %v1876_v17 = vmul.f32 %v2618_v1, %v1874_v2 }
0x11ee   :  { %1878 = vrot.lane.b32.xlu1 %v1876_v17, %s2759_s2 }
0x11ef   :  { %v1869_v6 = vpop.permute.xlu0 %1868 }
0x11f0   :  { %v1871_v9 = vmul.f32 %v2618_v1, %v1869_v6 }
0x11f1   :  { %v1904_v4 = vpop.permute.xlu1 %1903 }
0x11f2   :  { %v1906_v19 = vmul.f32 %v2620_v3, %v1904_v4 }
0x11f3   :  { %v1899_v16 = vpop.permute.xlu0 %1898 }
0x11f4   :  { %1908 = vrot.lane.b32.xlu1 %v1906_v19, %s2759_s2  ;;  %v1901_v18 = vmul.f32 %v2620_v3, %v1899_v16 }
0x1260   :  { %v1879_v10 = vpop.permute.xlu1 %1878 }
0x1261   :  { %v1881_v12 = vadd.f32 %v1879_v10, %v1871_v9 }
0x1263   :  { %2621 = vtanh.f32 %v1881_v12 }
0x1266   :  { %v1909_v21 = vpop.permute.xlu1 %1908 }
0x1267   :  { %v1911_v22 = vadd.f32 %v1909_v21, %v1901_v18 }
0x1269   :  { %2623 = vtanh.f32 %v1911_v22 }
0x1270   :  { %v2622_v23 = vpop.eup %2621 }
0x1271   :  { %1884 = vrot.lane.b32.xlu0 %v2622_v23, %s2760_s4 }
0x1276   :  { %v2624_v24 = vpop.eup %2623 }
0x1277   :  { %1914 = vrot.lane.b32.xlu1 %v2624_v24, %s2760_s4 }
0x12e3   :  { %v1885_v25 = vpop.permute.xlu0 %1884 }
0x12e4   :  { %v1887_v26 = vmul.f32 %v2618_v1, %v1885_v25 }
0x12e6   :  { %1919 = vrot.lane.b32.xlu0 %v1887_v26, %s2759_s2 }
0x12e9   :  { %v1915_v27 = vpop.permute.xlu1 %1914 }
0x12ea   :  { %v3136_v28 = vmul.f32 %v2620_v3, %v1915_v27  ;;  %1924 = vrot.lane.b32.xlu0 %v1881_v12, %s2761_s16 }
0x12ec   :  { %1929 = vrot.lane.b32.xlu1 %v3136_v28, %s2759_s2 }
0x12f0   :  { %1934 = vrot.lane.b32.xlu1 %v1911_v22, %s2761_s16 }
0x1358   :  { %v3142_v29 = vpop.permute.xlu0 %1919 }
0x1359   :  { %1922 = vst.msk [vmem:[#allocation3 - $0x4] sm:$0x30] %vm681_vm5, %v3142_v29 }
0x135c   :  { %v1925_v30 = vpop.permute.xlu0 %1924 }
0x135d   :  { %1927 = vst.msk [vmem:[#allocation4 - $0x4] sm:$0x30] %vm681_vm5, %v1925_v30 }
0x135e   :  { %v1930_v31 = vpop.permute.xlu1 %1929 }
0x135f   :  { %1932 = vst.msk [vmem:[#allocation5 - $0x2] sm:$0xc] %vm670_vm4, %v1930_v31 }
0x1360   :  { %v1945_v32 = vld [vmem:[#allocation3] sm:$0x3] }
0x1361   :  { %2486 = vmatmul.mubr.msk.f32.vlgmr.msra.gmra.mxu1 %vm98_vm2, %v1945_v32 }
0x1362   :  { %v1935_v33 = vpop.permute.xlu1 %1934 }
0x1363   :  { %1937 = vst.msk [vmem:[#allocation6 - $0x2] sm:$0xc] %vm670_vm4, %v1935_v33 }
0x1364   :  { %v2106_v49 = vld [vmem:[#allocation4] sm:$0x3] }
0x1365   :  { %v2115_v50 = vrot.slane %v2106_v49, 2 }
0x1366   :  { %v2027_v34 = vld [vmem:[#allocation5] sm:$0x3] }
0x1367   :  { %2497 = vmatmul.mubr.msk.f32.vlgmr.msra.gmra.mxu0 %vm98_vm2, %v2027_v34 }
0x136a   :  { %v2136_v52 = vld [vmem:[#allocation6] sm:$0x3] }
0x1421   :  { %v2019_v35 = vpop.f32.mrf.mxu1 }
0x1422   :  { %v2024_v36 = vrot.slane %v2019_v35, 2 }
0x1423   :  { %v2487_v40 = vpop.f32.mrf.mxu1 }
0x1424   :  { %v2026_v43 = vadd.f32 %v2024_v36, %v1943_v37 }
0x1426   :  { %2625 = vtanh.f32 %v2026_v43  ;;  %v2241_v53 = vmul.f32 -1.442695, %v2026_v43 }
0x1427   :  { %v2101_v45 = vpop.f32.mrf.mxu0 }
0x1428   :  { %v2105_v46 = vadd.f32 %v2101_v45, %v1944_v44 }
0x1429   :  { %v2498_v47 = vpop.f32.mrf.mxu0 }
0x142a   :  { %2627 = vtanh.f32 %v2105_v46  ;;  %v2242_v54 = vmul.f32 -1.442695, %v2105_v46 }
0x142b   :  { %2629 = vpow2.f32 %v2241_v53 }
0x142c   :  { %2631 = vpow2.f32 %v2242_v54 }
0x1433   :  { %v2626_v48 = vpop.eup %2625 }
0x1434   :  { %2121 = vrot.lane.b32.xlu0 %v2626_v48, %s2760_s4 }
0x1437   :  { %v2628_v51 = vpop.eup %2627 }
0x1438   :  { %2150 = vrot.lane.b32.xlu1 %v2628_v51, %s2760_s4  ;;  %2116 = vrot.lane.b32.xlu0 %v2115_v50, %s2759_s2  ;;  %v2630_v56 = vpop.eup %2629 }
0x1439   :  { %v2110_v57 = vadd.f32 1.0, %v2630_v56  ;;  %v2632_v58 = vpop.eup %2631 }
0x143a   :  { %v2140_v59 = vadd.f32 1.0, %v2632_v58 }
0x143b   :  { %2633 = vrcp.f32 %v2110_v57 }
0x143c   :  { %2145 = vrot.lane.b32.xlu1 %v2136_v52, %s2759_s2  ;;  %2635 = vrcp.f32 %v2140_v59 }
0x1448   :  { %v2634_v60 = vpop.eup %2633 }
0x1449   :  { %v2636_v7 = vpop.eup %2635 }
0x14a6   :  { %v2122_v61 = vpop.permute.xlu0 %2121 }
0x14a7   :  { %v2124_v0 = vmul.f32 %v2634_v60, %v2122_v61 }
0x14a9   :  { %2126 = vrot.lane.b32.xlu0 %v2124_v0, %s2759_s2 }
0x14aa   :  { %v2151_v8 = vpop.permute.xlu1 %2150  ;;  %v2117_v13 = vpop.permute.xlu0 %2116 }
0x14ab   :  { %v2153_v11 = vmul.f32 %v2636_v7, %v2151_v8  ;;  %v2119_v14 = vmul.f32 %v2634_v60, %v2117_v13 }
0x14ad   :  { %2155 = vrot.lane.b32.xlu1 %v2153_v11, %s2759_s2 }
0x14ae   :  { %v2146_v15 = vpop.permute.xlu1 %2145 }
0x14af   :  { %v2148_v2 = vmul.f32 %v2636_v7, %v2146_v15 }
0x151b   :  { %v2127_v63 = vpop.permute.xlu0 %2126 }
0x151c   :  { %v2129_v1 = vadd.f32 %v2127_v63, %v2119_v14 }
0x151e   :  { %2637 = vtanh.f32 %v2129_v1 }
0x151f   :  { %v2156_v17 = vpop.permute.xlu1 %2155 }
0x1520   :  { %v2158_v3 = vadd.f32 %v2156_v17, %v2148_v2 }
0x1522   :  { %2639 = vtanh.f32 %v2158_v3 }
0x152b   :  { %v2638_v4 = vpop.eup %2637 }
0x152c   :  { %2132 = vrot.lane.b32.xlu0 %v2638_v4, %s2760_s4 }
0x152f   :  { %v2640_v19 = vpop.eup %2639 }
0x1530   :  { %2161 = vrot.lane.b32.xlu1 %v2640_v19, %s2760_s4  ;;  %435 = vrot.lane.b32.xlu0 %v2898_v20, %s2760_s4 }
0x1534   :  { %689 = vrot.lane.b32.xlu1 %v2940_v5, %s2760_s4  ;;  %941 = vrot.lane.b32.xlu0 %v2982_v62, %s2760_s4 }
0x1538   :  { %1189 = vrot.lane.b32.xlu1 %v3024_v55, %s2760_s4  ;;  %1437 = vrot.lane.b32.xlu0 %v3066_v41, %s2760_s4 }
0x153c   :  { %1688 = vrot.lane.b32.xlu1 %v3102_v38, %s2760_s4  ;;  %1939 = vrot.lane.b32.xlu0 %v3136_v28, %s2760_s4 }
0x1540   :  { %2171 = vrot.lane.b32.xlu1 %v2129_v1, %s2761_s16 }
0x159e   :  { %v2133_v20 = vpop.permute.xlu0 %2132 }
0x159f   :  { %v2135_v6 = vmul.f32 %v2634_v60, %v2133_v20 }
0x15a1   :  { %2166 = vrot.lane.b32.xlu1 %v2135_v6, %s2759_s2 }
0x15a2   :  { %v2162_v5 = vpop.permute.xlu1 %2161  ;;  %v436_v62 = vpop.permute.xlu0 %435 }
0x15a3   :  { %v2164_v9 = vmul.f32 %v2636_v7, %v2162_v5  ;;  %439 = vst.msk [vmem:[#allocation15 + $0x8] sm:$0xc0] %vm438_vm6, %v436_v62 }
0x15a5   :  { %2186 = vrot.lane.b32.xlu0 %v2164_v9, %s2760_s4  ;;  %2181 = vrot.lane.b32.xlu1 %v2158_v3, %s2761_s16 }
0x15a6   :  { %v690_v55 = vpop.permute.xlu1 %689  ;;  %v942_v41 = vpop.permute.xlu0 %941 }
0x15a7   :  { %693 = vst.msk [vmem:[#allocation15 + $0x8] sm:$0x30] %vm692_vm7, %v690_v55 }
0x15a8   :  { %945 = vst.msk [vmem:[#allocation15 + $0x8] sm:$0xc] %vm944_vm8, %v942_v41 }
0x15a9   :  { %1938 = vst.msk [vmem:[#allocation15 + $0x8] sm:$0x30] %vm681_vm5, %v3142_v29  ;;  %2176 = vrot.lane.b32.xlu0 %v2164_v9, %s2759_s2 }
0x15aa   :  { %1687 = vst.msk [vmem:[#allocation15 + $0x8] sm:$0xc] %vm670_vm4, %v3108_v39  ;;  %v1190_v38 = vpop.permute.xlu1 %1189  ;;  %v1438_v10 = vpop.permute.xlu0 %1437 }
0x15ab   :  { %1193 = vst.msk [vmem:[#allocation15 + $0x8] sm:$0x3] %vm1192_vm9, %v1190_v38 }
0x15ac   :  { %1440 = vst.msk [vmem:[#allocation15] sm:$0xc0] %vm438_vm6, %v1438_v10 }
0x15ad   :  { %1436 = vst.msk [vmem:[#allocation15 + $0x8] sm:$0x3] %vm186_vm0, %v3072_v42 }
0x15ae   :  { %v1689_v12 = vpop.permute.xlu1 %1688  ;;  %v1940_v16 = vpop.permute.xlu0 %1939 }
0x15af   :  { %1691 = vst.msk [vmem:[#allocation15] sm:$0x30] %vm692_vm7, %v1689_v12 }
0x15b0   :  { %1942 = vst.msk [vmem:[#allocation15] sm:$0xc] %vm944_vm8, %v1940_v16 }
0x15b2   :  { %v2172_v18 = vpop.permute.xlu1 %2171 }
0x15b3   :  { %2174 = vst.msk [vmem:[#allocation4 - $0x6] sm:$0xc0] %vm427_vm3, %v2172_v18 }
0x1613   :  { %v2167_v39 = vpop.permute.xlu1 %2166 }
0x1614   :  { %2169 = vst.msk [vmem:[#allocation3 - $0x6] sm:$0xc0] %vm427_vm3, %v2167_v39  ;;  %2185 = vst.msk [vmem:[#allocation15 + $0x8] sm:$0xc0] %vm427_vm3, %v2167_v39 }
0x1617   :  { %v2182_v21 = vpop.permute.xlu1 %2181  ;;  %v2187_v22 = vpop.permute.xlu0 %2186 }
0x1618   :  { %2184 = vst.msk [vmem:[#allocation6] sm:$0x3] %vm186_vm0, %v2182_v21 }
0x1619   :  { %2189 = vst.msk [vmem:[#allocation15] sm:$0x3] %vm1192_vm9, %v2187_v22 }
0x161a   :  { %2732 = shalt.err (!%p2729_p10)
}
0x161b   :  { %2201 = dma.vmem_to_hbm [thread:$0]  %s2196_s18, 256, %s3208_s5, [#allocation9], %s2753_s28, %s2753_s28, %s2754_s29   ;;  %v2177_v42 = vpop.permute.xlu0 %2176 }
0x161c   :  { %2179 = vst.msk [vmem:[#allocation5] sm:$0x3] %vm186_vm0, %v2177_v42 }
0x161d   :  { %2747 = dma.done.wait [#allocation9], 256  }
0x161e   :  { %2748 = vsyncadd [#allocation9], 4294967040 }
0x161f   :  { %2205 = vsyncpa [#allocation8], 1 }
0x1620   :  { %2206 = vsyncpa [#allocation11], 1 }
0x1621   :  { %2207 = vsyncpa [#allocation14], 1 }
0x1622   :  { %2208 = vsyncpa [#allocation9], 1 }

</bundles_post_ra>
